<compile_context>
chip_gen: v6e
topology: v6e:2x2x1
jax: 0.10.0
libtpu: 0.0.40
codegen_flags: <defaults>
</compile_context>

<pallas_src>
import functools

import jax
import jax.numpy as jnp
from jax.experimental import pallas as pl
from jax.experimental.pallas import tpu as pltpu

LANE = 128
MATMUL_DTYPE = jnp.bfloat16   # MXU-native; accumulation stays f32.


# ----------------------------------------------------------------------------
# Fused kernel: 5-layer point MLP -> global max pool -> classification head
# ----------------------------------------------------------------------------
def pointnet_kernel(x_ref,
                    w1_ref, s1_ref,
                    w2_ref, s2_ref,
                    w3_ref, s3_ref,
                    w4_ref, s4_ref,
                    w5_ref, s5_ref,
                    w6_ref, s6_ref,
                    w7_ref, b7_ref,
                    out_ref, pooled_ref, *, ew_dtype):
    block_b = x_ref.shape[0]
    nk = pl.program_id(1)
    last_nk = pl.num_programs(1) - 1

    # Running max over N tiles lives in f32 scratch (block_b, emb).
    @pl.when(nk == 0)
    def _():
        pooled_ref[...] = jnp.full(pooled_ref.shape, -jnp.inf,
                                   dtype=pooled_ref.dtype)

    def layer(h, w_ref, s_ref):
        # bf16 MXU matmul, f32 accumulation; shift/relu in ew_dtype on the VPU.
        y = jnp.dot(h.astype(w_ref.dtype), w_ref[...],
                    preferred_element_type=jnp.float32)
        return jnp.maximum(y.astype(ew_dtype) + s_ref[...], 0)

    for b in range(block_b):                       # static unroll (small)
        x_b = x_ref[b]                             # (3, block_n), lane-dense
        # Layer 1 on the MXU in channel-major orientation (K=3 costs the same
        # pushes as K=64), then one XLU transpose of the 64-wide output to
        # point-rows; shift applied post-transpose as a sublane broadcast.
        h_cm = jnp.dot(w1_ref[...], x_b.astype(w1_ref.dtype),
                       preferred_element_type=jnp.float32)   # (64, block_n)
        h = jnp.transpose(h_cm.astype(ew_dtype))             # (block_n, 64)
        h = jnp.maximum(h + s1_ref[...], 0)

        h = layer(h, w2_ref, s2_ref)               # (block_n, 64)
        h = layer(h, w3_ref, s3_ref)               # (block_n, 64)
        h = layer(h, w4_ref, s4_ref)               # (block_n, 128)
        h = layer(h, w5_ref, s5_ref)               # (block_n, emb)

        # adaptive_max_pool1d(x, 1): running max over this N tile.
        row_max = jnp.max(h, axis=0, keepdims=True).astype(jnp.float32)
        pooled_ref[b:b + 1, :] = jnp.maximum(pooled_ref[b:b + 1, :], row_max)

    # Head runs once per B-block, only after the last N tile (M = block_b).
    @pl.when(nk == last_nk)
    def _():
        pooled = pooled_ref[...]                                  # (block_b, emb)
        g = jnp.dot(pooled.astype(w6_ref.dtype), w6_ref[...],
                    preferred_element_type=jnp.float32)
        g = jnp.maximum(g.astype(ew_dtype) + s6_ref[...], 0)
        # TODO(synk): nn.Dropout() training-mode masking not implemented
        # (eval-mode identity).
        logits = jnp.dot(g.astype(w7_ref.dtype), w7_ref[...],
                         preferred_element_type=jnp.float32)
        out_ref[...] = logits + b7_ref[...]        # (block_b, 128) lane-dense


# ----------------------------------------------------------------------------
# Wrapper
# ----------------------------------------------------------------------------
def _const_spec(p):
    return pl.BlockSpec(p.shape, lambda i, k: (0,) * p.ndim)


def _pointnet_pallas(x_bcn, params, *, block_b, block_n, ew_dtype,
                     vmem_limit_bytes):
    B, C, N = x_bcn.shape
    assert B % block_b == 0 and N % block_n == 0, (B, N, block_b, block_n)
    emb = params[9].shape[1]            # s5 width == emb_dims
    c_pad = params[-2].shape[1]         # padded logits width (multiple of 128)

    in_specs = [pl.BlockSpec((block_b, C, block_n), lambda i, k: (i, 0, k))]
    in_specs += [_const_spec(p) for p in params]

    return pl.pallas_call(
        functools.partial(pointnet_kernel, ew_dtype=ew_dtype),
        out_shape=jax.ShapeDtypeStruct((B, c_pad), jnp.float32),
        grid_spec=pltpu.PrefetchScalarGridSpec(
            num_scalar_prefetch=0,
            grid=(B // block_b, N // block_n),
            in_specs=in_specs,
            out_specs=pl.BlockSpec((block_b, c_pad), lambda i, k: (i, 0)),
            scratch_shapes=[pltpu.VMEM((block_b, emb), jnp.float32)],
        ),
        compiler_params=pltpu.CompilerParams(
            dimension_semantics=("parallel", "arbitrary"),
            vmem_limit_bytes=vmem_limit_bytes),
    )(x_bcn, *params)


@functools.partial(jax.jit, static_argnames=("num_classes", "block_b",
                                             "block_n", "ew_dtype",
                                             "vmem_limit_bytes"))
def pointnet_forward(x_bcn, params, *, num_classes, block_b, block_n,
                     ew_dtype, vmem_limit_bytes):
    logits_padded = _pointnet_pallas(
        x_bcn.astype(jnp.float32), params, block_b=block_b, block_n=block_n,
        ew_dtype=ew_dtype, vmem_limit_bytes=vmem_limit_bytes)
    return logits_padded[:, :num_classes]


def _device_profile():
    """Generation-aware knobs: bf16 elementwise + 2-TC rule + VMEM budget."""
    try:
        kind = jax.devices()[0].device_kind.lower()
    except Exception:   # pragma: no cover
        kind = ""
    is_v7 = "v7" in kind
    old_gen = any(g in kind for g in ("v2", "v3", "v4", "v5"))
    return dict(
        ew_dtype=jnp.float32 if old_gen else jnp.bfloat16,  # no bf16 VALU <= v5
        two_cores=is_v7,
        target_rows=4096 if is_v7 else 8192,                # v7x: 64 MiB VMEM
        vmem_limit_bytes=(48 if is_v7 else 64) * 1024 * 1024,
    )


def _pick_tiles(B, N, *, two_cores, target_rows, max_block_b=16):
    """Pick (block_b, block_n).

    block_b: divisor of B that keeps the (block_b, c_pad) output store
    sublane-clean (== B or a multiple of 8); on 2-TC chips prefer leaving
    >= 2 B-blocks for megacore.  block_n: multiple of 128 dividing N within
    the row budget (block_b * block_n <= target_rows), else full N.
    """
    clean = [d for d in range(1, min(B, max_block_b) + 1)
             if B % d == 0 and (d == B or d % 8 == 0)]
    if not clean:
        clean = [B]   # TODO(synk): awkward B unrolls the per-b chain heavily
    fitting = [d for d in clean if d * min(N, LANE) <= target_rows] or clean
    multi = [d for d in fitting if B // d >= 2]
    block_b = max(multi) if (two_cores and multi) else max(fitting)

    block_n = N
    if N % LANE == 0:
        block_n = LANE
        for cand in range(LANE, N + 1, LANE):
            if N % cand == 0 and block_b * cand <= target_rows:
                block_n = cand
    return block_b, block_n


# ----------------------------------------------------------------------------
# Parameters (deterministic), BN folding, pure-JAX reference
# ----------------------------------------------------------------------------
def make_raw_params(key, emb_dims=128, output_channels=40):
    dims = [(3, 64), (64, 64), (64, 64), (64, 128), (128, emb_dims)]
    keys = jax.random.split(key, 64)
    ki = iter(range(64))
    nxt = lambda: keys[next(ki)]

    conv_w, conv_bn = [], []
    for cin, cout in dims:
        w = 0.1 * jax.random.normal(nxt(), (cin, cout), jnp.float32)
        gamma = 1.0 + 0.1 * jax.random.normal(nxt(), (cout,), jnp.float32)
        beta = 0.1 * jax.random.normal(nxt(), (cout,), jnp.float32)
        mean = 0.05 * jax.random.normal(nxt(), (cout,), jnp.float32)
        var = 1.0 + 0.1 * jax.random.uniform(nxt(), (cout,), jnp.float32)
        conv_w.append(w)
        conv_bn.append((gamma, beta, mean, var))

    w6 = 0.05 * jax.random.normal(nxt(), (emb_dims, 512), jnp.float32)
    bn6 = (1.0 + 0.1 * jax.random.normal(nxt(), (512,), jnp.float32),
           0.1 * jax.random.normal(nxt(), (512,), jnp.float32),
           0.05 * jax.random.normal(nxt(), (512,), jnp.float32),
           1.0 + 0.1 * jax.random.uniform(nxt(), (512,), jnp.float32))
    w7 = 0.05 * jax.random.normal(nxt(), (512, output_channels), jnp.float32)
    b7 = 0.1 * jax.random.normal(nxt(), (output_channels,), jnp.float32)
    return dict(conv_w=conv_w, conv_bn=conv_bn, w6=w6, bn6=bn6, w7=w7, b7=b7)


def prepare_kernel_params(raw, *, ew_dtype, eps=1e-5, matmul_dtype=MATMUL_DTYPE):
    """Fold BN scale into weights; layer-1 stored channel-major (64, 3)."""
    params = []

    # conv1: channel-major (Cout, Cin) for the (C, N)-orientation MXU matmul.
    w1, (g, b, m, v) = raw["conv_w"][0], raw["conv_bn"][0]
    scale = g / jnp.sqrt(v + eps)
    shift = (b - m * scale).reshape(1, -1)
    params += [(w1 * scale[None, :]).T.astype(matmul_dtype),
               shift.astype(ew_dtype)]

    # conv2..conv5: point-rows (Cin, Cout).
    for w, (g, b, m, v) in zip(raw["conv_w"][1:], raw["conv_bn"][1:]):
        scale = g / jnp.sqrt(v + eps)
        shift = (b - m * scale).reshape(1, -1)
        params += [(w * scale[None, :]).astype(matmul_dtype),
                   shift.astype(ew_dtype)]

    # linear1 + bn6.
    g, b, m, v = raw["bn6"]
    scale = g / jnp.sqrt(v + eps)
    shift6 = (b - m * scale).reshape(1, -1)
    params += [(raw["w6"] * scale[None, :]).astype(matmul_dtype),
               shift6.astype(ew_dtype)]

    # linear2 padded to a multiple of 128 output lanes -> unmasked stores.
    C = raw["w7"].shape[1]
    c_pad = ((C + LANE - 1) // LANE) * LANE
    w7p = jnp.zeros((raw["w7"].shape[0], c_pad), matmul_dtype)
    w7p = w7p.at[:, :C].set(raw["w7"].astype(matmul_dtype))
    b7p = jnp.zeros((1, c_pad), jnp.float32).at[0, :C].set(raw["b7"])
    params += [w7p, b7p]
    return tuple(params)


def pointnet_reference(x_bcn, raw, eps=1e-5):
    h = jnp.transpose(x_bcn, (0, 2, 1)).astype(jnp.float32)
    for w, (g, b, m, v) in zip(raw["conv_w"], raw["conv_bn"]):
        y = jnp.einsum("bnc,cd->bnd", h, w)
        y = (y - m) * (g / jnp.sqrt(v + eps)) + b
        h = jnp.maximum(y, 0.0)
    pooled = jnp.max(h, axis=1)
    g, b, m, v = raw["bn6"]
    y = pooled @ raw["w6"]
    y = (y - m) * (g / jnp.sqrt(v + eps)) + b
    y = jnp.maximum(y, 0.0)
    return y @ raw["w7"] + raw["b7"]


# ----------------------------------------------------------------------------
if __name__ == "__main__":
    key = jax.random.PRNGKey(0)
    k_x, k_p = jax.random.split(key)

    B, N, emb_dims, num_classes = 2, 128, 128, 40
    x = jax.random.normal(k_x, (B, 3, N), dtype=jnp.float32)   # (B, C=3, N) NCW

    prof = _device_profile()
    raw = make_raw_params(k_p, emb_dims=emb_dims, output_channels=num_classes)
    params = prepare_kernel_params(raw, ew_dtype=prof["ew_dtype"])
    block_b, block_n = _pick_tiles(B, N, two_cores=prof["two_cores"],
                                   target_rows=prof["target_rows"])

    out = pointnet_forward(x, params, num_classes=num_classes,
                           block_b=block_b, block_n=block_n,
                           ew_dtype=prof["ew_dtype"],
                           vmem_limit_bytes=prof["vmem_limit_bytes"])
    out = jax.block_until_ready(out)

    ref = pointnet_reference(x, raw)
    assert out.shape == (B, num_classes), out.shape
    ref_scale = float(jnp.max(jnp.abs(ref)))
    max_err = float(jnp.max(jnp.abs(out - ref)))
    # bf16 matmul (and bf16 elementwise on v6e/v7x) -> loosened tolerance.
    assert max_err <= 3e-2 + 3e-2 * ref_scale, (max_err, ref_scale)

    print("KERNEL_OK")
</pallas_src>

<mosaic_0001>
module attributes {stable_mosaic.version = 11 : i64} {
  func.func @pointnet_kernel(%arg0: i32, %arg1: i32, %arg2: memref<2x3x128xf32, #tpu.memory_space<vmem>>, %arg3: memref<64x3xbf16, #tpu.memory_space<vmem>>, %arg4: memref<1x64xbf16, #tpu.memory_space<vmem>>, %arg5: memref<64x64xbf16, #tpu.memory_space<vmem>>, %arg6: memref<1x64xbf16, #tpu.memory_space<vmem>>, %arg7: memref<64x64xbf16, #tpu.memory_space<vmem>>, %arg8: memref<1x64xbf16, #tpu.memory_space<vmem>>, %arg9: memref<64x128xbf16, #tpu.memory_space<vmem>>, %arg10: memref<1x128xbf16, #tpu.memory_space<vmem>>, %arg11: memref<128x128xbf16, #tpu.memory_space<vmem>>, %arg12: memref<1x128xbf16, #tpu.memory_space<vmem>>, %arg13: memref<128x512xbf16, #tpu.memory_space<vmem>>, %arg14: memref<1x512xbf16, #tpu.memory_space<vmem>>, %arg15: memref<512x128xbf16, #tpu.memory_space<vmem>>, %arg16: memref<1x128xf32, #tpu.memory_space<vmem>>, %arg17: memref<2x128xf32, #tpu.memory_space<vmem>>, %arg18: memref<2x128xf32, #tpu.memory_space<vmem>>) attributes {dimension_semantics = [#tpu.dimension_semantics<parallel>, #tpu.dimension_semantics<arbitrary>], iteration_bounds = array<i64: 1, 1>, scalar_prefetch = 0 : i64, scratch_operands = 1 : i64, tpu.core_type = #tpu.core_type<tc>, window_params = [{transform_indices = @transform_0, window_bounds = array<i64: 2, 3, 128>}, {pipeline_mode = #tpu.pipeline_mode<synchronous>, transform_indices = @transform_1, window_bounds = array<i64: 64, 3>}, {pipeline_mode = #tpu.pipeline_mode<synchronous>, transform_indices = @transform_2, window_bounds = array<i64: 1, 64>}, {pipeline_mode = #tpu.pipeline_mode<synchronous>, transform_indices = @transform_3, window_bounds = array<i64: 64, 64>}, {pipeline_mode = #tpu.pipeline_mode<synchronous>, transform_indices = @transform_4, window_bounds = array<i64: 1, 64>}, {pipeline_mode = #tpu.pipeline_mode<synchronous>, transform_indices = @transform_5, window_bounds = array<i64: 64, 64>}, {pipeline_mode = #tpu.pipeline_mode<synchronous>, transform_indices = @transform_6, window_bounds = array<i64: 1, 64>}, {pipeline_mode = #tpu.pipeline_mode<synchronous>, transform_indices = @transform_7, window_bounds = array<i64: 64, 128>}, {pipeline_mode = #tpu.pipeline_mode<synchronous>, transform_indices = @transform_8, window_bounds = array<i64: 1, 128>}, {pipeline_mode = #tpu.pipeline_mode<synchronous>, transform_indices = @transform_9, window_bounds = array<i64: 128, 128>}, {pipeline_mode = #tpu.pipeline_mode<synchronous>, transform_indices = @transform_10, window_bounds = array<i64: 1, 128>}, {pipeline_mode = #tpu.pipeline_mode<synchronous>, transform_indices = @transform_11, window_bounds = array<i64: 128, 512>}, {pipeline_mode = #tpu.pipeline_mode<synchronous>, transform_indices = @transform_12, window_bounds = array<i64: 1, 512>}, {pipeline_mode = #tpu.pipeline_mode<synchronous>, transform_indices = @transform_13, window_bounds = array<i64: 512, 128>}, {pipeline_mode = #tpu.pipeline_mode<synchronous>, transform_indices = @transform_14, window_bounds = array<i64: 1, 128>}, {transform_indices = @transform_15, window_bounds = array<i64: 2, 128>}]} {
    %c0_i32 = arith.constant 0 : i32
    %0 = arith.cmpi eq, %arg1, %c0_i32 : i32
    %1 = arith.extui %0 : i1 to i32
    %c0_i32_0 = arith.constant 0 : i32
    %2 = arith.cmpi ne, %1, %c0_i32_0 : i32
    scf.if %2 {
      %cst_76 = arith.constant 0xFF800000 : f32
      %106 = vector.broadcast %cst_76 : f32 to vector<2x128xf32>
      %c0_77 = arith.constant 0 : index
      %c0_78 = arith.constant 0 : index
      %107 = vector.load %arg18[%c0_77, %c0_78] : memref<2x128xf32, #tpu.memory_space<vmem>>, vector<2x128xf32>
      tpu.vector_store %arg18[%c0_77, %c0_78], %106 {strides = array<i32>} : memref<2x128xf32, #tpu.memory_space<vmem>>, vector<2x128xf32>,
    } else {
    }
    %c0 = arith.constant 0 : index
    %c0_1 = arith.constant 0 : index
    %c0_2 = arith.constant 0 : index
    %3 = vector.load %arg2[%c0, %c0_1, %c0_2] : memref<2x3x128xf32, #tpu.memory_space<vmem>>, vector<1x3x128xf32>
    %4 = vector.shape_cast %3 : vector<1x3x128xf32> to vector<3x128xf32>
    %c0_3 = arith.constant 0 : index
    %c0_4 = arith.constant 0 : index
    %5 = vector.load %arg3[%c0_3, %c0_4] : memref<64x3xbf16, #tpu.memory_space<vmem>>, vector<64x3xbf16>
    %6 = arith.truncf %4 : vector<3x128xf32> to vector<3x128xbf16>
    %cst = arith.constant dense<0.000000e+00> : vector<64x128xf32>
    %7 = tpu.matmul %5, %6, %cst {dimension_numbers = #tpu.dot_dimension_numbers<[1], [0], [0], [1], [0, 0, 1, 1], [], []>} : vector<64x3xbf16>, vector<3x128xbf16>, vector<64x128xf32> -> vector<64x128xf32>
    %8 = arith.truncf %7 : vector<64x128xf32> to vector<64x128xbf16>
    %9 = tpu.transpose %8, [1, 0] : vector<64x128xbf16> -> vector<128x64xbf16>
    %c0_5 = arith.constant 0 : index
    %c0_6 = arith.constant 0 : index
    %10 = vector.load %arg4[%c0_5, %c0_6] : memref<1x64xbf16, #tpu.memory_space<vmem>>, vector<1x64xbf16>
    %11 = vector.broadcast %10 : vector<1x64xbf16> to vector<128x64xbf16>
    %12 = arith.addf %9, %11 : vector<128x64xbf16>
    %cst_7 = arith.constant 0.000000e+00 : bf16
    %13 = vector.broadcast %cst_7 : bf16 to vector<128x64xbf16>
    %14 = arith.maximumf %12, %13 : vector<128x64xbf16>
    %c0_8 = arith.constant 0 : index
    %c0_9 = arith.constant 0 : index
    %15 = vector.load %arg5[%c0_8, %c0_9] : memref<64x64xbf16, #tpu.memory_space<vmem>>, vector<64x64xbf16>
    %cst_10 = arith.constant dense<0.000000e+00> : vector<128x64xf32>
    %16 = tpu.matmul %14, %15, %cst_10 {dimension_numbers = #tpu.dot_dimension_numbers<[1], [0], [0], [1], [0, 0, 1, 1], [], []>} : vector<128x64xbf16>, vector<64x64xbf16>, vector<128x64xf32> -> vector<128x64xf32>
    %17 = arith.truncf %16 : vector<128x64xf32> to vector<128x64xbf16>
    %c0_11 = arith.constant 0 : index
    %c0_12 = arith.constant 0 : index
    %18 = vector.load %arg6[%c0_11, %c0_12] : memref<1x64xbf16, #tpu.memory_space<vmem>>, vector<1x64xbf16>
    %19 = vector.broadcast %18 : vector<1x64xbf16> to vector<128x64xbf16>
    %20 = arith.addf %17, %19 : vector<128x64xbf16>
    %cst_13 = arith.constant 0.000000e+00 : bf16
    %21 = vector.broadcast %cst_13 : bf16 to vector<128x64xbf16>
    %22 = arith.maximumf %20, %21 : vector<128x64xbf16>
    %c0_14 = arith.constant 0 : index
    %c0_15 = arith.constant 0 : index
    %23 = vector.load %arg7[%c0_14, %c0_15] : memref<64x64xbf16, #tpu.memory_space<vmem>>, vector<64x64xbf16>
    %cst_16 = arith.constant dense<0.000000e+00> : vector<128x64xf32>
    %24 = tpu.matmul %22, %23, %cst_16 {dimension_numbers = #tpu.dot_dimension_numbers<[1], [0], [0], [1], [0, 0, 1, 1], [], []>} : vector<128x64xbf16>, vector<64x64xbf16>, vector<128x64xf32> -> vector<128x64xf32>
    %25 = arith.truncf %24 : vector<128x64xf32> to vector<128x64xbf16>
    %c0_17 = arith.constant 0 : index
    %c0_18 = arith.constant 0 : index
    %26 = vector.load %arg8[%c0_17, %c0_18] : memref<1x64xbf16, #tpu.memory_space<vmem>>, vector<1x64xbf16>
    %27 = vector.broadcast %26 : vector<1x64xbf16> to vector<128x64xbf16>
    %28 = arith.addf %25, %27 : vector<128x64xbf16>
    %cst_19 = arith.constant 0.000000e+00 : bf16
    %29 = vector.broadcast %cst_19 : bf16 to vector<128x64xbf16>
    %30 = arith.maximumf %28, %29 : vector<128x64xbf16>
    %c0_20 = arith.constant 0 : index
    %c0_21 = arith.constant 0 : index
    %31 = vector.load %arg9[%c0_20, %c0_21] : memref<64x128xbf16, #tpu.memory_space<vmem>>, vector<64x128xbf16>
    %cst_22 = arith.constant dense<0.000000e+00> : vector<128x128xf32>
    %32 = tpu.matmul %30, %31, %cst_22 {dimension_numbers = #tpu.dot_dimension_numbers<[1], [0], [0], [1], [0, 0, 1, 1], [], []>} : vector<128x64xbf16>, vector<64x128xbf16>, vector<128x128xf32> -> vector<128x128xf32>
    %33 = arith.truncf %32 : vector<128x128xf32> to vector<128x128xbf16>
    %c0_23 = arith.constant 0 : index
    %c0_24 = arith.constant 0 : index
    %34 = vector.load %arg10[%c0_23, %c0_24] : memref<1x128xbf16, #tpu.memory_space<vmem>>, vector<1x128xbf16>
    %35 = vector.broadcast %34 : vector<1x128xbf16> to vector<128x128xbf16>
    %36 = arith.addf %33, %35 : vector<128x128xbf16>
    %cst_25 = arith.constant 0.000000e+00 : bf16
    %37 = vector.broadcast %cst_25 : bf16 to vector<128x128xbf16>
    %38 = arith.maximumf %36, %37 : vector<128x128xbf16>
    %c0_26 = arith.constant 0 : index
    %c0_27 = arith.constant 0 : index
    %39 = vector.load %arg11[%c0_26, %c0_27] : memref<128x128xbf16, #tpu.memory_space<vmem>>, vector<128x128xbf16>
    %cst_28 = arith.constant dense<0.000000e+00> : vector<128x128xf32>
    %40 = tpu.matmul %38, %39, %cst_28 {dimension_numbers = #tpu.dot_dimension_numbers<[1], [0], [0], [1], [0, 0, 1, 1], [], []>} : vector<128x128xbf16>, vector<128x128xbf16>, vector<128x128xf32> -> vector<128x128xf32>
    %41 = arith.truncf %40 : vector<128x128xf32> to vector<128x128xbf16>
    %c0_29 = arith.constant 0 : index
    %c0_30 = arith.constant 0 : index
    %42 = vector.load %arg12[%c0_29, %c0_30] : memref<1x128xbf16, #tpu.memory_space<vmem>>, vector<1x128xbf16>
    %43 = vector.broadcast %42 : vector<1x128xbf16> to vector<128x128xbf16>
    %44 = arith.addf %41, %43 : vector<128x128xbf16>
    %cst_31 = arith.constant 0.000000e+00 : bf16
    %45 = vector.broadcast %cst_31 : bf16 to vector<128x128xbf16>
    %46 = arith.maximumf %44, %45 : vector<128x128xbf16>
    %cst_32 = arith.constant dense<0xFF80> : vector<128xbf16>
    %47 = vector.multi_reduction <maximumf>, %46, %cst_32 [0] : vector<128x128xbf16> to vector<128xbf16>
    %48 = vector.shape_cast %47 : vector<128xbf16> to vector<1x128xbf16>
    %49 = arith.extf %48 : vector<1x128xbf16> to vector<1x128xf32>
    %c0_33 = arith.constant 0 : index
    %c0_34 = arith.constant 0 : index
    %50 = vector.load %arg18[%c0_33, %c0_34] : memref<2x128xf32, #tpu.memory_space<vmem>>, vector<1x128xf32>
    %51 = arith.maximumf %50, %49 : vector<1x128xf32>
    %c0_35 = arith.constant 0 : index
    %c0_36 = arith.constant 0 : index
    %52 = vector.load %arg18[%c0_35, %c0_36] : memref<2x128xf32, #tpu.memory_space<vmem>>, vector<1x128xf32>
    tpu.vector_store %arg18[%c0_35, %c0_36], %51 {strides = array<i32>} : memref<2x128xf32, #tpu.memory_space<vmem>>, vector<1x128xf32>,
    %c1 = arith.constant 1 : index
    %c0_37 = arith.constant 0 : index
    %c0_38 = arith.constant 0 : index
    %53 = vector.load %arg2[%c1, %c0_37, %c0_38] : memref<2x3x128xf32, #tpu.memory_space<vmem>>, vector<1x3x128xf32>
    %54 = vector.shape_cast %53 : vector<1x3x128xf32> to vector<3x128xf32>
    %c0_39 = arith.constant 0 : index
    %c0_40 = arith.constant 0 : index
    %55 = vector.load %arg3[%c0_39, %c0_40] : memref<64x3xbf16, #tpu.memory_space<vmem>>, vector<64x3xbf16>
    %56 = arith.truncf %54 : vector<3x128xf32> to vector<3x128xbf16>
    %cst_41 = arith.constant dense<0.000000e+00> : vector<64x128xf32>
    %57 = tpu.matmul %55, %56, %cst_41 {dimension_numbers = #tpu.dot_dimension_numbers<[1], [0], [0], [1], [0, 0, 1, 1], [], []>} : vector<64x3xbf16>, vector<3x128xbf16>, vector<64x128xf32> -> vector<64x128xf32>
    %58 = arith.truncf %57 : vector<64x128xf32> to vector<64x128xbf16>
    %59 = tpu.transpose %58, [1, 0] : vector<64x128xbf16> -> vector<128x64xbf16>
    %c0_42 = arith.constant 0 : index
    %c0_43 = arith.constant 0 : index
    %60 = vector.load %arg4[%c0_42, %c0_43] : memref<1x64xbf16, #tpu.memory_space<vmem>>, vector<1x64xbf16>
    %61 = vector.broadcast %60 : vector<1x64xbf16> to vector<128x64xbf16>
    %62 = arith.addf %59, %61 : vector<128x64xbf16>
    %cst_44 = arith.constant 0.000000e+00 : bf16
    %63 = vector.broadcast %cst_44 : bf16 to vector<128x64xbf16>
    %64 = arith.maximumf %62, %63 : vector<128x64xbf16>
    %c0_45 = arith.constant 0 : index
    %c0_46 = arith.constant 0 : index
    %65 = vector.load %arg5[%c0_45, %c0_46] : memref<64x64xbf16, #tpu.memory_space<vmem>>, vector<64x64xbf16>
    %cst_47 = arith.constant dense<0.000000e+00> : vector<128x64xf32>
    %66 = tpu.matmul %64, %65, %cst_47 {dimension_numbers = #tpu.dot_dimension_numbers<[1], [0], [0], [1], [0, 0, 1, 1], [], []>} : vector<128x64xbf16>, vector<64x64xbf16>, vector<128x64xf32> -> vector<128x64xf32>
    %67 = arith.truncf %66 : vector<128x64xf32> to vector<128x64xbf16>
    %c0_48 = arith.constant 0 : index
    %c0_49 = arith.constant 0 : index
    %68 = vector.load %arg6[%c0_48, %c0_49] : memref<1x64xbf16, #tpu.memory_space<vmem>>, vector<1x64xbf16>
    %69 = vector.broadcast %68 : vector<1x64xbf16> to vector<128x64xbf16>
    %70 = arith.addf %67, %69 : vector<128x64xbf16>
    %cst_50 = arith.constant 0.000000e+00 : bf16
    %71 = vector.broadcast %cst_50 : bf16 to vector<128x64xbf16>
    %72 = arith.maximumf %70, %71 : vector<128x64xbf16>
    %c0_51 = arith.constant 0 : index
    %c0_52 = arith.constant 0 : index
    %73 = vector.load %arg7[%c0_51, %c0_52] : memref<64x64xbf16, #tpu.memory_space<vmem>>, vector<64x64xbf16>
    %cst_53 = arith.constant dense<0.000000e+00> : vector<128x64xf32>
    %74 = tpu.matmul %72, %73, %cst_53 {dimension_numbers = #tpu.dot_dimension_numbers<[1], [0], [0], [1], [0, 0, 1, 1], [], []>} : vector<128x64xbf16>, vector<64x64xbf16>, vector<128x64xf32> -> vector<128x64xf32>
    %75 = arith.truncf %74 : vector<128x64xf32> to vector<128x64xbf16>
    %c0_54 = arith.constant 0 : index
    %c0_55 = arith.constant 0 : index
    %76 = vector.load %arg8[%c0_54, %c0_55] : memref<1x64xbf16, #tpu.memory_space<vmem>>, vector<1x64xbf16>
    %77 = vector.broadcast %76 : vector<1x64xbf16> to vector<128x64xbf16>
    %78 = arith.addf %75, %77 : vector<128x64xbf16>
    %cst_56 = arith.constant 0.000000e+00 : bf16
    %79 = vector.broadcast %cst_56 : bf16 to vector<128x64xbf16>
    %80 = arith.maximumf %78, %79 : vector<128x64xbf16>
    %c0_57 = arith.constant 0 : index
    %c0_58 = arith.constant 0 : index
    %81 = vector.load %arg9[%c0_57, %c0_58] : memref<64x128xbf16, #tpu.memory_space<vmem>>, vector<64x128xbf16>
    %cst_59 = arith.constant dense<0.000000e+00> : vector<128x128xf32>
    %82 = tpu.matmul %80, %81, %cst_59 {dimension_numbers = #tpu.dot_dimension_numbers<[1], [0], [0], [1], [0, 0, 1, 1], [], []>} : vector<128x64xbf16>, vector<64x128xbf16>, vector<128x128xf32> -> vector<128x128xf32>
    %83 = arith.truncf %82 : vector<128x128xf32> to vector<128x128xbf16>
    %c0_60 = arith.constant 0 : index
    %c0_61 = arith.constant 0 : index
    %84 = vector.load %arg10[%c0_60, %c0_61] : memref<1x128xbf16, #tpu.memory_space<vmem>>, vector<1x128xbf16>
    %85 = vector.broadcast %84 : vector<1x128xbf16> to vector<128x128xbf16>
    %86 = arith.addf %83, %85 : vector<128x128xbf16>
    %cst_62 = arith.constant 0.000000e+00 : bf16
    %87 = vector.broadcast %cst_62 : bf16 to vector<128x128xbf16>
    %88 = arith.maximumf %86, %87 : vector<128x128xbf16>
    %c0_63 = arith.constant 0 : index
    %c0_64 = arith.constant 0 : index
    %89 = vector.load %arg11[%c0_63, %c0_64] : memref<128x128xbf16, #tpu.memory_space<vmem>>, vector<128x128xbf16>
    %cst_65 = arith.constant dense<0.000000e+00> : vector<128x128xf32>
    %90 = tpu.matmul %88, %89, %cst_65 {dimension_numbers = #tpu.dot_dimension_numbers<[1], [0], [0], [1], [0, 0, 1, 1], [], []>} : vector<128x128xbf16>, vector<128x128xbf16>, vector<128x128xf32> -> vector<128x128xf32>
    %91 = arith.truncf %90 : vector<128x128xf32> to vector<128x128xbf16>
    %c0_66 = arith.constant 0 : index
    %c0_67 = arith.constant 0 : index
    %92 = vector.load %arg12[%c0_66, %c0_67] : memref<1x128xbf16, #tpu.memory_space<vmem>>, vector<1x128xbf16>
    %93 = vector.broadcast %92 : vector<1x128xbf16> to vector<128x128xbf16>
    %94 = arith.addf %91, %93 : vector<128x128xbf16>
    %cst_68 = arith.constant 0.000000e+00 : bf16
    %95 = vector.broadcast %cst_68 : bf16 to vector<128x128xbf16>
    %96 = arith.maximumf %94, %95 : vector<128x128xbf16>
    %cst_69 = arith.constant dense<0xFF80> : vector<128xbf16>
    %97 = vector.multi_reduction <maximumf>, %96, %cst_69 [0] : vector<128x128xbf16> to vector<128xbf16>
    %98 = vector.shape_cast %97 : vector<128xbf16> to vector<1x128xbf16>
    %99 = arith.extf %98 : vector<1x128xbf16> to vector<1x128xf32>
    %c1_70 = arith.constant 1 : index
    %c0_71 = arith.constant 0 : index
    %100 = vector.load %arg18[%c1_70, %c0_71] : memref<2x128xf32, #tpu.memory_space<vmem>>, vector<1x128xf32>
    %101 = arith.maximumf %100, %99 : vector<1x128xf32>
    %c1_72 = arith.constant 1 : index
    %c0_73 = arith.constant 0 : index
    %102 = vector.load %arg18[%c1_72, %c0_73] : memref<2x128xf32, #tpu.memory_space<vmem>>, vector<1x128xf32>
    tpu.vector_store %arg18[%c1_72, %c0_73], %101 {strides = array<i32>} : memref<2x128xf32, #tpu.memory_space<vmem>>, vector<1x128xf32>,
    %c0_i32_74 = arith.constant 0 : i32
    %103 = arith.cmpi eq, %arg1, %c0_i32_74 : i32
    %104 = arith.extui %103 : i1 to i32
    %c0_i32_75 = arith.constant 0 : i32
    %105 = arith.cmpi ne, %104, %c0_i32_75 : i32
    scf.if %105 {
      %c0_76 = arith.constant 0 : index
      %c0_77 = arith.constant 0 : index
      %106 = vector.load %arg18[%c0_76, %c0_77] : memref<2x128xf32, #tpu.memory_space<vmem>>, vector<2x128xf32>
      %107 = arith.truncf %106 : vector<2x128xf32> to vector<2x128xbf16>
      %c0_78 = arith.constant 0 : index
      %c0_79 = arith.constant 0 : index
      %108 = vector.load %arg13[%c0_78, %c0_79] : memref<128x512xbf16, #tpu.memory_space<vmem>>, vector<128x512xbf16>
      %cst_80 = arith.constant dense<0.000000e+00> : vector<2x512xf32>
      %109 = tpu.matmul %107, %108, %cst_80 {dimension_numbers = #tpu.dot_dimension_numbers<[1], [0], [0], [1], [0, 0, 1, 1], [], []>} : vector<2x128xbf16>, vector<128x512xbf16>, vector<2x512xf32> -> vector<2x512xf32>
      %110 = arith.truncf %109 : vector<2x512xf32> to vector<2x512xbf16>
      %c0_81 = arith.constant 0 : index
      %c0_82 = arith.constant 0 : index
      %111 = vector.load %arg14[%c0_81, %c0_82] : memref<1x512xbf16, #tpu.memory_space<vmem>>, vector<1x512xbf16>
      %112 = vector.broadcast %111 : vector<1x512xbf16> to vector<2x512xbf16>
      %113 = arith.addf %110, %112 : vector<2x512xbf16>
      %cst_83 = arith.constant 0.000000e+00 : bf16
      %114 = vector.broadcast %cst_83 : bf16 to vector<2x512xbf16>
      %115 = arith.maximumf %113, %114 : vector<2x512xbf16>
      %c0_84 = arith.constant 0 : index
      %c0_85 = arith.constant 0 : index
      %116 = vector.load %arg15[%c0_84, %c0_85] : memref<512x128xbf16, #tpu.memory_space<vmem>>, vector<512x128xbf16>
      %cst_86 = arith.constant dense<0.000000e+00> : vector<2x128xf32>
      %117 = tpu.matmul %115, %116, %cst_86 {dimension_numbers = #tpu.dot_dimension_numbers<[1], [0], [0], [1], [0, 0, 1, 1], [], []>} : vector<2x512xbf16>, vector<512x128xbf16>, vector<2x128xf32> -> vector<2x128xf32>
      %c0_87 = arith.constant 0 : index
      %c0_88 = arith.constant 0 : index
      %118 = vector.load %arg16[%c0_87, %c0_88] : memref<1x128xf32, #tpu.memory_space<vmem>>, vector<1x128xf32>
      %119 = vector.broadcast %118 : vector<1x128xf32> to vector<2x128xf32>
      %120 = arith.addf %117, %119 : vector<2x128xf32>
      %c0_89 = arith.constant 0 : index
      %c0_90 = arith.constant 0 : index
      %121 = vector.load %arg17[%c0_89, %c0_90] : memref<2x128xf32, #tpu.memory_space<vmem>>, vector<2x128xf32>
      tpu.vector_store %arg17[%c0_89, %c0_90], %120 {strides = array<i32>} : memref<2x128xf32, #tpu.memory_space<vmem>>, vector<2x128xf32>,
    } else {
    }
    return
  }
  func.func @transform_0(%arg0: i32, %arg1: i32) -> (i32, i32, i32) {
    %c0_i32 = arith.constant 0 : i32
    %c0_i32_0 = arith.constant 0 : i32
    return %arg0, %c0_i32, %arg1 : i32, i32, i32
  }
  func.func @transform_1(%arg0: i32, %arg1: i32) -> (i32, i32) {
    %c0_i32 = arith.constant 0 : i32
    %c0_i32_0 = arith.constant 0 : i32
    %c0_i32_1 = arith.constant 0 : i32
    return %c0_i32, %c0_i32_0 : i32, i32
  }
  func.func @transform_2(%arg0: i32, %arg1: i32) -> (i32, i32) {
    %c0_i32 = arith.constant 0 : i32
    %c0_i32_0 = arith.constant 0 : i32
    %c0_i32_1 = arith.constant 0 : i32
    return %c0_i32, %c0_i32_0 : i32, i32
  }
  func.func @transform_3(%arg0: i32, %arg1: i32) -> (i32, i32) {
    %c0_i32 = arith.constant 0 : i32
    %c0_i32_0 = arith.constant 0 : i32
    %c0_i32_1 = arith.constant 0 : i32
    return %c0_i32, %c0_i32_0 : i32, i32
  }
  func.func @transform_4(%arg0: i32, %arg1: i32) -> (i32, i32) {
    %c0_i32 = arith.constant 0 : i32
    %c0_i32_0 = arith.constant 0 : i32
    %c0_i32_1 = arith.constant 0 : i32
    return %c0_i32, %c0_i32_0 : i32, i32
  }
  func.func @transform_5(%arg0: i32, %arg1: i32) -> (i32, i32) {
    %c0_i32 = arith.constant 0 : i32
    %c0_i32_0 = arith.constant 0 : i32
    %c0_i32_1 = arith.constant 0 : i32
    return %c0_i32, %c0_i32_0 : i32, i32
  }
  func.func @transform_6(%arg0: i32, %arg1: i32) -> (i32, i32) {
    %c0_i32 = arith.constant 0 : i32
    %c0_i32_0 = arith.constant 0 : i32
    %c0_i32_1 = arith.constant 0 : i32
    return %c0_i32, %c0_i32_0 : i32, i32
  }
  func.func @transform_7(%arg0: i32, %arg1: i32) -> (i32, i32) {
    %c0_i32 = arith.constant 0 : i32
    %c0_i32_0 = arith.constant 0 : i32
    %c0_i32_1 = arith.constant 0 : i32
    return %c0_i32, %c0_i32_0 : i32, i32
  }
  func.func @transform_8(%arg0: i32, %arg1: i32) -> (i32, i32) {
    %c0_i32 = arith.constant 0 : i32
    %c0_i32_0 = arith.constant 0 : i32
    %c0_i32_1 = arith.constant 0 : i32
    return %c0_i32, %c0_i32_0 : i32, i32
  }
  func.func @transform_9(%arg0: i32, %arg1: i32) -> (i32, i32) {
    %c0_i32 = arith.constant 0 : i32
    %c0_i32_0 = arith.constant 0 : i32
    %c0_i32_1 = arith.constant 0 : i32
    return %c0_i32, %c0_i32_0 : i32, i32
  }
  func.func @transform_10(%arg0: i32, %arg1: i32) -> (i32, i32) {
    %c0_i32 = arith.constant 0 : i32
    %c0_i32_0 = arith.constant 0 : i32
    %c0_i32_1 = arith.constant 0 : i32
    return %c0_i32, %c0_i32_0 : i32, i32
  }
  func.func @transform_11(%arg0: i32, %arg1: i32) -> (i32, i32) {
    %c0_i32 = arith.constant 0 : i32
    %c0_i32_0 = arith.constant 0 : i32
    %c0_i32_1 = arith.constant 0 : i32
    return %c0_i32, %c0_i32_0 : i32, i32
  }
  func.func @transform_12(%arg0: i32, %arg1: i32) -> (i32, i32) {
    %c0_i32 = arith.constant 0 : i32
    %c0_i32_0 = arith.constant 0 : i32
    %c0_i32_1 = arith.constant 0 : i32
    return %c0_i32, %c0_i32_0 : i32, i32
  }
  func.func @transform_13(%arg0: i32, %arg1: i32) -> (i32, i32) {
    %c0_i32 = arith.constant 0 : i32
    %c0_i32_0 = arith.constant 0 : i32
    %c0_i32_1 = arith.constant 0 : i32
    return %c0_i32, %c0_i32_0 : i32, i32
  }
  func.func @transform_14(%arg0: i32, %arg1: i32) -> (i32, i32) {
    %c0_i32 = arith.constant 0 : i32
    %c0_i32_0 = arith.constant 0 : i32
    %c0_i32_1 = arith.constant 0 : i32
    return %c0_i32, %c0_i32_0 : i32, i32
  }
  func.func @transform_15(%arg0: i32, %arg1: i32) -> (i32, i32) {
    %c0_i32 = arith.constant 0 : i32
    %c0_i32_0 = arith.constant 0 : i32
    return %arg0, %c0_i32 : i32, i32
  }
}

</mosaic_0001>

<bundles_post_ra>
// kernel: pointnet_forward.1
= control target key start
LH: loop header
LB: loop body
LE: loop exit
PB: predicated region body
PF: predicated region fallthrough
CT: control target
= control target key end

     0   :  { %20 = vsyncpa [#allocation4], 0  ;;  %s4077_s0 = inlined_call_operand.vmem [shape: f32[2,3,128], index: 0, kind: input, shape index: {}]   ;;  %s4078_s1 = inlined_call_operand.vmem [shape: bf16[64,3], index: 1, kind: input, shape index: {}]   ;;  %s4079_s2 = inlined_call_operand.hbm [shape: bf16[1,64], index: 2, kind: input, shape index: {}]   ;;  %s4080_s3 = inlined_call_operand.hbm [shape: bf16[64,64], index: 3, kind: input, shape index: {}]   ;;  %s4081_s4 = inlined_call_operand.hbm [shape: bf16[1,64], index: 4, kind: input, shape index: {}]   ;;  %s4082_s5 = inlined_call_operand.hbm [shape: bf16[64,64], index: 5, kind: input, shape index: {}]   ;;  %s4083_s6 = inlined_call_operand.hbm [shape: bf16[1,64], index: 6, kind: input, shape index: {}]   ;;  %s4084_s7 = inlined_call_operand.hbm [shape: bf16[64,128], index: 7, kind: input, shape index: {}]   ;;  %s4085_s8 = inlined_call_operand.hbm [shape: bf16[1,128], index: 8, kind: input, shape index: {}]   ;;  %s4086_s9 = inlined_call_operand.vmem [shape: bf16[128,128], index: 9, kind: input, shape index: {}]   ;;  %s4087_s10 = inlined_call_operand.hbm [shape: bf16[1,128], index: 10, kind: input, shape index: {}]   ;;  %s4088_s11 = inlined_call_operand.hbm [shape: bf16[128,512], index: 11, kind: input, shape index: {}]   ;;  %s4089_s12 = inlined_call_operand.vmem [shape: bf16[1,512], index: 12, kind: input, shape index: {}]   ;;  %s4090_s13 = inlined_call_operand.hbm [shape: bf16[512,128], index: 13, kind: input, shape index: {}]   ;;  %s4091_s14 = inlined_call_operand.vmem [shape: f32[1,128], index: 14, kind: input, shape index: {}]   ;;  %s4092_s15 = inlined_call_operand.hbm [shape: f32[2,128], index: 15, kind: output, shape index: {}]  }
   0x1   :  { %21 = vsyncpa [#allocation7], 0 }
   0x2   :  { %22 = vsyncpa [#allocation10], 0 }
   0x3   :  { %23 = vsyncpa [#allocation13], 0 }
   0x4   :  { %24 = vsyncpa [#allocation16], 0 }
   0x5   :  { %25 = vsyncpa [#allocation19], 0 }
   0x6   :  { %26 = vsyncpa [#allocation5], 0  ;;  %s3683_s18 = smov [#allocation6]  }
   0x7   :  { %s46_s19 = sshll.u32 %s3683_s18, 4  ;;  %s47_s19 = int_to_ptr.vmem [resolvable:$true] %s46_s19 }
   0x8   :  { %s3457_s20 = scalar_lea.vmem %s47_s19, 512  ;;  %p3462_p1 = scmp.lt.s32.totalorder %s47_s19, %s47_s19 }
   0x9   :  { %p3458_p0 = scmp.ne.s32.totalorder %s47_s19, %s3457_s20  ;;  %p3463_p2 = scmp.lt.s32.totalorder %s3457_s20, %s3457_s20 }
   0xb   :  { %p3464_p3 = por %p3463_p2, %p3462_p1 }
   0xd   :  { %p3465_p4 = pnand %p3464_p3, %p3458_p0 }
   0xf   :  { %3468 = shalt.err (!%p3465_p4)
}
  0x10   :  { %s3684_s21 = smov 64   ;;  %s3685_s22 = smov 4  }
  0x11   :  { %52 = dma.hbm_to_vmem [thread:$0]  %s4080_s3, 512, %s47_s19, [#allocation7], %s3684_s21, %s3684_s21, %s3685_s22  }
  0x12   :  { %s3686_s25 = smov [#allocation9]   ;;  %s3687_s27 = smov [#allocation12]  }
  0x13   :  { %s68_s26 = sshll.u32 %s3686_s25, 4  ;;  %s90_s28 = sshll.u32 %s3687_s27, 4  ;;  %s69_s26 = int_to_ptr.vmem [resolvable:$true] %s68_s26  ;;  %s91_s28 = int_to_ptr.vmem [resolvable:$true] %s90_s28 }
  0x14   :  { %s3477_s29 = scalar_lea.vmem %s69_s26, 512  ;;  %p3482_p6 = scmp.lt.s32.totalorder %s69_s26, %s69_s26 }
  0x15   :  { %p3478_p5 = scmp.ne.s32.totalorder %s69_s26, %s3477_s29  ;;  %p3483_p7 = scmp.lt.s32.totalorder %s3477_s29, %s3477_s29 }
  0x17   :  { %p3484_p8 = por %p3483_p7, %p3482_p6 }
  0x19   :  { %p3485_p9 = pnand %p3484_p8, %p3478_p5 }
  0x1b   :  { %3488 = shalt.err (!%p3485_p9)
}
  0x1c   :  { %74 = dma.hbm_to_vmem [thread:$0]  %s4082_s5, 512, %s69_s26, [#allocation10], %s3684_s21, %s3684_s21, %s3685_s22  }
  0x1d   :  { %s3497_s3 = scalar_lea.vmem %s91_s28, 512  ;;  %p3502_p11 = scmp.lt.s32.totalorder %s91_s28, %s91_s28 }
  0x1e   :  { %p3498_p10 = scmp.ne.s32.totalorder %s91_s28, %s3497_s3  ;;  %p3503_p12 = scmp.lt.s32.totalorder %s3497_s3, %s3497_s3 }
  0x20   :  { %p3504_p13 = por %p3503_p12, %p3502_p11 }
  0x22   :  { %p3505_p0 = pnand %p3504_p13, %p3498_p10 }
  0x24   :  { %3508 = shalt.err (!%p3505_p0)
}
  0x25   :  { %96 = dma.hbm_to_vmem [thread:$0]  %s4084_s7, 512, %s91_s28, [#allocation13], %s3684_s21, %s3684_s21, %s3685_s22  }
  0x26   :  { %s3688_s19 = smov [#allocation15]   ;;  %s3689_s23 = smov [#allocation3]  }
  0x27   :  { %s115_s20 = sshll.u32 %s3688_s19, 4  ;;  %s37_s5 = sshll.u32 %s3689_s23, 4  ;;  %s116_s20 = int_to_ptr.vmem [resolvable:$true] %s115_s20  ;;  %s38_s5 = int_to_ptr.vmem [resolvable:$true] %s37_s5 }
  0x28   :  { %s3517_s24 = scalar_lea.vmem %s116_s20, 16  ;;  %s3521_s25 = scalar_lea.vmem %s116_s20, 32 }
  0x29   :  { %p3518_p1 = scmp.ne.s32.totalorder %s116_s20, %s3517_s24  ;;  %p3522_p2 = scmp.lt.s32.totalorder %s116_s20, %s116_s20 }
  0x2a   :  { %p3523_p3 = scmp.lt.s32.totalorder %s3521_s25, %s3517_s24 }
  0x2c   :  { %p3524_p4 = por %p3523_p3, %p3522_p2 }
  0x2e   :  { %p3525_p5 = pnand %p3524_p4, %p3518_p1 }
  0x30   :  { %3528 = shalt.err (!%p3525_p5)
}
  0x31   :  { %118 = dma.hbm_to_vmem [thread:$0]  %s4087_s10, 16, %s116_s20, [#allocation16]  }
  0x32   :  { %s3537_s29 = scalar_lea.vmem %s38_s5, 16  ;;  %s3541_s7 = scalar_lea.vmem %s38_s5, 32 }
  0x33   :  { %p3538_p6 = scmp.ne.s32.totalorder %s38_s5, %s3537_s29  ;;  %p3542_p7 = scmp.lt.s32.totalorder %s38_s5, %s38_s5 }
  0x34   :  { %p3543_p8 = scmp.lt.s32.totalorder %s3541_s7, %s3537_s29 }
  0x36   :  { %p3544_p9 = por %p3543_p8, %p3542_p7 }
  0x38   :  { %p3545_p10 = pnand %p3544_p9, %p3538_p6 }
  0x3a   :  { %3548 = shalt.err (!%p3545_p10)
}
  0x3b   :  { %40 = dma.hbm_to_vmem [thread:$0]  %s4079_s2, 16, %s38_s5, [#allocation4]  }
  0x3c   :  { %s3690_s16 = smov [#allocation8]   ;;  %s3691_s17 = smov [#allocation11]  }
  0x3d   :  { %s59_s3 = sshll.u32 %s3690_s16, 4  ;;  %s81_s18 = sshll.u32 %s3691_s17, 4  ;;  %s60_s3 = int_to_ptr.vmem [resolvable:$true] %s59_s3  ;;  %s82_s18 = int_to_ptr.vmem [resolvable:$true] %s81_s18 }
  0x3e   :  { %s3557_s19 = scalar_lea.vmem %s60_s3, 16  ;;  %s3561_s10 = scalar_lea.vmem %s60_s3, 32 }
  0x3f   :  { %p3558_p11 = scmp.ne.s32.totalorder %s60_s3, %s3557_s19  ;;  %p3562_p12 = scmp.lt.s32.totalorder %s60_s3, %s60_s3 }
  0x40   :  { %p3563_p13 = scmp.lt.s32.totalorder %s3561_s10, %s3557_s19 }
  0x42   :  { %p3564_p0 = por %p3563_p13, %p3562_p12 }
  0x44   :  { %p3565_p1 = pnand %p3564_p0, %p3558_p11 }
  0x46   :  { %3568 = shalt.err (!%p3565_p1)
}
  0x47   :  { %62 = dma.hbm_to_vmem [thread:$0]  %s4081_s4, 16, %s60_s3, [#allocation7]  }
  0x48   :  { %s3577_s24 = scalar_lea.vmem %s82_s18, 16  ;;  %s3581_s2 = scalar_lea.vmem %s82_s18, 32 }
  0x49   :  { %p3578_p2 = scmp.ne.s32.totalorder %s82_s18, %s3577_s24  ;;  %p3582_p3 = scmp.lt.s32.totalorder %s82_s18, %s82_s18 }
  0x4a   :  { %p3583_p4 = scmp.lt.s32.totalorder %s3581_s2, %s3577_s24 }
  0x4c   :  { %p3584_p5 = por %p3583_p4, %p3582_p3 }
  0x4e   :  { %p3585_p6 = pnand %p3584_p5, %p3578_p2 }
  0x50   :  { %3588 = shalt.err (!%p3585_p6)
}
  0x51   :  { %84 = dma.hbm_to_vmem [thread:$0]  %s4083_s6, 16, %s82_s18, [#allocation10]  }
  0x52   :  { %s3692_s26 = smov [#allocation14]   ;;  %s3693_s29 = smov [#allocation17]  }
  0x53   :  { %s103_s27 = sshll.u32 %s3692_s26, 4  ;;  %s124_s7 = sshll.u32 %s3693_s29, 4  ;;  %s104_s27 = int_to_ptr.vmem [resolvable:$true] %s103_s27  ;;  %s125_s7 = int_to_ptr.vmem [resolvable:$true] %s124_s7 }
  0x54   :  { %s3597_s28 = scalar_lea.vmem %s104_s27, 16  ;;  %s3601_s4 = scalar_lea.vmem %s104_s27, 32 }
  0x55   :  { %p3598_p7 = scmp.ne.s32.totalorder %s104_s27, %s3597_s28  ;;  %p3602_p8 = scmp.lt.s32.totalorder %s104_s27, %s104_s27 }
  0x56   :  { %p3603_p9 = scmp.lt.s32.totalorder %s3601_s4, %s3597_s28 }
  0x58   :  { %p3604_p10 = por %p3603_p9, %p3602_p8 }
  0x5a   :  { %p3605_p11 = pnand %p3604_p10, %p3598_p7 }
  0x5c   :  { %3608 = shalt.err (!%p3605_p11)
}
  0x5d   :  { %106 = dma.hbm_to_vmem [thread:$0]  %s4085_s8, 16, %s104_s27, [#allocation13]  }
  0x5e   :  { %s3617_s3 = scalar_lea.vmem %s125_s7, 4096  ;;  %p3622_p13 = scmp.lt.s32.totalorder %s125_s7, %s125_s7 }
  0x5f   :  { %p3618_p12 = scmp.ne.s32.totalorder %s125_s7, %s3617_s3  ;;  %p3623_p0 = scmp.lt.s32.totalorder %s3617_s3, %s3617_s3 }
  0x61   :  { %p3624_p1 = por %p3623_p0, %p3622_p13 }
  0x63   :  { %p3625_p2 = pnand %p3624_p1, %p3618_p12 }
  0x65   :  { %3628 = shalt.err (!%p3625_p2)
}
  0x66   :  { %s3694_s6 = smov 256   ;;  %s3695_s17 = smov 16  }
  0x67   :  { %130 = dma.hbm_to_vmem [thread:$0]  %s4088_s11, 4096, %s125_s7, [#allocation16], %s3694_s6, %s3694_s6, %s3695_s17  }
  0x68   :  { %s3696_s10 = smov [#allocation18]  }
  0x69   :  { %s138_s20 = sshll.u32 %s3696_s10, 4  ;;  %s139_s20 = int_to_ptr.vmem [resolvable:$true] %s138_s20 }
  0x6a   :  { %s3637_s23 = scalar_lea.vmem %s139_s20, 4096  ;;  %p3642_p4 = scmp.lt.s32.totalorder %s139_s20, %s139_s20 }
  0x6b   :  { %p3638_p3 = scmp.ne.s32.totalorder %s139_s20, %s3637_s23  ;;  %p3643_p5 = scmp.lt.s32.totalorder %s3637_s23, %s3637_s23 }
  0x6d   :  { %p3644_p6 = por %p3643_p5, %p3642_p4 }
  0x6f   :  { %p3645_p7 = pnand %p3644_p6, %p3638_p3 }
  0x71   :  { %3648 = shalt.err (!%p3645_p7)
}
  0x72   :  { %144 = dma.hbm_to_vmem [thread:$0]  %s4090_s13, 4096, %s139_s20, [#allocation19], %s3684_s21, %s3684_s21, %s3685_s22  }
  0x73   :  { %3669 = dma.done.wait [#allocation4], 16  }
  0x74   :  { %3670 = vsyncadd [#allocation4], 4294967280 }
  0x75   :  { %3671 = dma.done.wait [#allocation7], 528  }
  0x76   :  { %3672 = vsyncadd [#allocation7], 4294966768 }
  0x77   :  { %3673 = dma.done.wait [#allocation10], 528  }
  0x78   :  { %3674 = vsyncadd [#allocation10], 4294966768 }
  0x79   :  { %3675 = dma.done.wait [#allocation13], 528  }
  0x7a   :  { %3676 = vsyncadd [#allocation13], 4294966768 }
  0x7b   :  { %3677 = dma.done.wait [#allocation16], 4112  }
  0x7c   :  { %3678 = vsyncadd [#allocation16], 4294963184 }
  0x7d   :  { %3679 = dma.done.wait [#allocation19], 4096  }
  0x7e   :  { %3680 = vsyncadd [#allocation19], 4294963200  ;;  %vm226_vm0 = vcmask 1040384   ;;  %vm227_vm1 = vcmask 1041408   ;;  %v3697_v0 = vmov 65535   ;;  %vm213_vm2 = vcmask 23552  }
  0x7f   :  { %v228_v1 = vsel %vm226_vm0, 4294967295, %v3697_v0  ;;  %v183_v2 = vld [vmem:[%s4077_s0] sm:$0x7]  ;;  %v3322_v7 = vld [vmem:[%s4078_s1 + $0x8] sm:$0xff]   ;;  %v3323_v8 = vld [vmem:[%s4078_s1 + $0x10] sm:$0xff]   ;;  %v322_v27 = vlaneseq  ;;  %vm374_vm3 = vcmask 523264  }
  0x80   :  { %v3827_v3 = vsel %vm227_vm1, %v228_v1, 0  ;;  %v192_v4 = vpack.c.bf16 %v183_v2, %v183_v2  ;;  %v3321_v5 = vld [vmem:[%s4078_s1] sm:$0xff]   ;;  %v3324_v9 = vld [vmem:[%s4078_s1 + $0x18] sm:$0xff]   ;;  %v3327_v12 = vld [vmem:[#allocation6 + $0x8] sm:$0xff]   ;;  %v3698_v35 = vmov 0   ;;  %s3701_s2 = smov [#allocation20]  }
  0x81   :  { %3076 = vmatprep.mubr.msk.bf16.mxu0 %vm213_vm2, %v3321_v5  ;;  %v3325_v10 = vld [vmem:[#allocation6 + $0x18] sm:$0xff]   ;;  %v3326_v11 = vld [vmem:[#allocation6 + $0x10] sm:$0xff]   ;;  %v3328_v13 = vld [vmem:[#allocation6] sm:$0xff]   ;;  %v3846_v28 = vshrl.u32 %v322_v27, 7  ;;  %s2731_s13 = sshll.u32 %s3701_s2, 4  ;;  %s2732_s13 = int_to_ptr.vmem [resolvable:$true] %s2731_s13 }
  0x82   :  { %v231_v6 = vand.u32 %v3827_v3, %v192_v4  ;;  %3084 = vmatprep.subr.bf16.mxu1 %v3325_v10  ;;  %v3329_v23 = vld [vmem:[#allocation9 + $0x18] sm:$0xff]   ;;  %v3330_v58 = vld [vmem:[#allocation9 + $0x10] sm:$0xff]   ;;  %v3331_v59 = vld [vmem:[#allocation9 + $0x8] sm:$0xff]   ;;  %s3649_s21 = scalar_lea.vmem %s2732_s13, 32  ;;  %p3654_p9 = scmp.lt.s32.totalorder %s2732_s13, %s2732_s13 }
  0x83   :  { %3085 = vmatpush3.bf16.msra.mxu1 %v3325_v10  ;;  %v318_v29 = vld [vmem:[#allocation3] sm:$0x1]  ;;  %v3849_v31 = vsub.s32 0, %v3846_v28  ;;  %v3332_v60 = vld [vmem:[#allocation9] sm:$0xff]   ;;  %v3334_v62 = vld [vmem:[#allocation12 + $0x10] sm:$0xff]   ;;  %p3650_p8 = scmp.ne.s32.totalorder %s2732_s13, %s3649_s21  ;;  %p3655_p10 = scmp.lt.s32.totalorder %s3649_s21, %s3649_s21 }
  0x84   :  { %3074 = vmatprep.subr.bf16.mxu0 %v231_v6  ;;  %3086 = vmatprep.subr.bf16.mxu1 %v3326_v11  ;;  %v320_v30 = vpack.i.b16 %v318_v29, %v318_v29  ;;  %v3333_v61 = vld [vmem:[#allocation12 + $0x18] sm:$0xff]   ;;  %v3335_v63 = vld [vmem:[#allocation12 + $0x8] sm:$0xff]  }
  0x85   :  { %3075 = vmatpush3.bf16.msra.mxu0 %v231_v6  ;;  %v504_v0 = vld [vmem:[#allocation8] sm:$0x1]  ;;  %p3656_p11 = por %p3655_p10, %p3654_p9 }
  0x86   :  { %3108 = vmatprep.subr.bf16.mxu0 %v3329_v23  ;;  %v325_v32 = vrot.slane %v320_v30, %v3849_v31  ;;  %v506_v2 = vpack.i.b16 %v504_v0, %v504_v0 }
  0x87   :  { %3087 = vmatpush3.bf16.msra.mxu1 %v3326_v11  ;;  %p3657_p12 = pnand %p3656_p11, %p3650_p8 }
  0x88   :  { %3077 = vmatmul.mubr.msk.bf16.vlgmr.msra.gmra.mxu0 %vm213_vm2, %v3322_v7  ;;  %3088 = vmatprep.subr.bf16.mxu1 %v3327_v12  ;;  %v511_v6 = vrot.slane %v506_v2, %v3849_v31 }
  0x89   :  { %3080 = vmatprep.mubr.msk.bf16.mxu0 %vm213_vm2, %v3323_v8  ;;  %3109 = vmatpush3.bf16.msra.mxu0 %v3329_v23 }
  0x8a   :  { %3110 = vmatprep.subr.bf16.mxu0 %v3330_v58 }
  0x8b   :  { %3089 = vmatpush3.bf16.msra.mxu1 %v3327_v12 }
  0x8c   :  { %3090 = vmatprep.subr.bf16.mxu1 %v3328_v13 }
  0x8d   :  { %3111 = vmatpush3.bf16.msra.mxu0 %v3330_v58 }
  0x8e   :  { %3112 = vmatprep.subr.bf16.mxu0 %v3331_v59 }
  0x8f   :  { %3091 = vmatpush3.bf16.msra.mxu1 %v3328_v13 }
  0x90   :  { %3081 = vmatmul.mubr.msk.bf16.gmra.mxu0 %vm213_vm2, %v3324_v9  ;;  %3132 = vmatprep.subr.bf16.mxu1 %v3333_v61 }
  0x91   :  { %3113 = vmatpush3.bf16.msra.mxu0 %v3331_v59 }
  0x92   :  { %3114 = vmatprep.subr.bf16.mxu0 %v3332_v60 }
  0x95   :  { %3115 = vmatpush3.bf16.msra.mxu0 %v3332_v60 }
 0x148   :  { %v3078_v14 = vpop.f32.mrf.mxu0 }
 0x14a   :  { %v267_v15 = vpop.f32.mrf.mxu0 }
 0x14c   :  { %v3079_v16 = vpop.f32.mrf.mxu0 }
 0x14d   :  { %v299_v21 = vpack.c.bf16 %v3079_v16, %v3078_v14 }
 0x14e   :  { %v270_v17 = vpop.f32.mrf.mxu0 }
 0x14f   :  { %v298_v18 = vpack.c.bf16 %v270_v17, %v267_v15 }
 0x150   :  { %v3082_v19 = vpop.f32.mrf.mxu0 }
 0x151   :  { %302 = vxpose.xlu0.c.b16.start [1/4] (short) %v298_v18, 128 }
 0x152   :  { %v283_v20 = vpop.f32.mrf.mxu0 }
 0x154   :  { %v3083_v22 = vpop.f32.mrf.mxu0 }
 0x155   :  { %303 = vxpose.xlu0.c.b16.cont [2/4] (short) %v299_v21, 128  ;;  %v301_v26 = vpack.c.bf16 %v3083_v22, %v3082_v19 }
 0x156   :  { %v286_v24 = vpop.f32.mrf.mxu0 }
 0x157   :  { %v300_v25 = vpack.c.bf16 %v286_v24, %v283_v20 }
 0x159   :  { %304 = vxpose.xlu0.c.b16.cont [3/4] (short) %v300_v25, 128 }
 0x15d   :  { %305 = vxpose.xlu0.c.b16.end [4/4] (short) %v301_v26, 128 }
 0x1b3   :  { %v310_v33 = vpop.trf.xlu0 }
 0x1b4   :  { %v326_v34 = vadd.bf16 %v325_v32, %v310_v33 }
 0x1b6   :  { %v334_v36 = vmax.bf16 %v3698_v35, %v326_v34 }
 0x1b7   :  { %v311_v37 = vpop.trf.xlu0 }
 0x1b8   :  { %v327_v38 = vadd.bf16 %v325_v32, %v311_v37  ;;  %3092 = vmatprep.mubr.msk.bf16.mxu1 %vm374_vm3, %v334_v36 }
 0x1ba   :  { %v335_v39 = vmax.bf16 %v3698_v35, %v327_v38 }
 0x1bb   :  { %v312_v40 = vpop.trf.xlu0 }
 0x1bc   :  { %v328_v41 = vadd.bf16 %v325_v32, %v312_v40  ;;  %3093 = vmatmul.mubr.msk.bf16.vlgmr.msra.gmra.mxu1 %vm374_vm3, %v335_v39 }
 0x1bd   :  { %3133 = vmatpush3.bf16.msra.mxu1 %v3333_v61 }
 0x1be   :  { %v336_v42 = vmax.bf16 %v3698_v35, %v328_v41  ;;  %3134 = vmatprep.subr.bf16.mxu1 %v3334_v62 }
 0x1bf   :  { %v313_v43 = vpop.trf.xlu0 }
 0x1c0   :  { %v329_v44 = vadd.bf16 %v325_v32, %v313_v43  ;;  %3096 = vmatprep.mubr.msk.bf16.mxu1 %vm374_vm3, %v336_v42 }
 0x1c1   :  { %3135 = vmatpush3.bf16.msra.mxu1 %v3334_v62 }
 0x1c2   :  { %v337_v45 = vmax.bf16 %v3698_v35, %v329_v44  ;;  %3136 = vmatprep.subr.bf16.mxu1 %v3335_v63 }
 0x1c3   :  { %v314_v46 = vpop.trf.xlu0 }
 0x1c4   :  { %v330_v47 = vadd.bf16 %v325_v32, %v314_v46  ;;  %3097 = vmatmul.mubr.msk.bf16.gmra.mxu1 %vm374_vm3, %v337_v45 }
 0x1c5   :  { %3137 = vmatpush3.bf16.msra.mxu1 %v3335_v63 }
 0x1c6   :  { %v338_v48 = vmax.bf16 %v3698_v35, %v330_v47  ;;  %v2797_v47 = vld [vmem:[%s4077_s0 + $0x4] sm:$0x7] }
 0x1c7   :  { %v315_v49 = vpop.trf.xlu0 }
 0x1c8   :  { %v331_v50 = vadd.bf16 %v325_v32, %v315_v49  ;;  %3100 = vmatprep.mubr.msk.bf16.mxu1 %vm374_vm3, %v338_v48  ;;  %v1122_v48 = vpack.c.bf16 %v2797_v47, %v2797_v47 }
 0x1ca   :  { %v339_v51 = vmax.bf16 %v3698_v35, %v331_v50  ;;  %v1156_v49 = vand.u32 %v1122_v48, %v3827_v3  ;;  %v3336_v50 = vld [vmem:[#allocation12] sm:$0xff]   ;;  %v3344_v3 = vld [vmem:[%s4086_s9 + $0x20] sm:$0xff]  }
 0x1cb   :  { %v316_v52 = vpop.trf.xlu0  ;;  %3138 = vmatprep.subr.bf16.mxu1 %v3336_v50 }
 0x1cc   :  { %v332_v53 = vadd.bf16 %v325_v32, %v316_v52  ;;  %3101 = vmatmul.mubr.msk.bf16.gmra.mxu1 %vm374_vm3, %v339_v51  ;;  %v3341_v51 = vld [vmem:[%s4086_s9 + $0x38] sm:$0xff]   ;;  %v3342_v52 = vld [vmem:[%s4086_s9 + $0x30] sm:$0xff]  }
 0x1cd   :  { %3139 = vmatpush3.bf16.msra.mxu1 %v3336_v50  ;;  %3156 = vmatprep.subr.bf16.mxu0 %v3341_v51 }
 0x1ce   :  { %v340_v54 = vmax.bf16 %v3698_v35, %v332_v53  ;;  %3188 = vmatprep.subr.bf16.mxu1 %v1156_v49  ;;  %v3343_v53 = vld [vmem:[%s4086_s9 + $0x28] sm:$0xff]  }
 0x1cf   :  { %v317_v55 = vpop.trf.xlu0 }
 0x1d0   :  { %v333_v56 = vadd.bf16 %v325_v32, %v317_v55  ;;  %3104 = vmatprep.mubr.msk.bf16.mxu1 %vm374_vm3, %v340_v54  ;;  %v3345_v54 = vld [vmem:[%s4086_s9 + $0x18] sm:$0xff]   ;;  %v689_v55 = vld [vmem:[#allocation11] sm:$0x1] }
 0x1d2   :  { %v341_v57 = vmax.bf16 %v3698_v35, %v333_v56 }
 0x1d4   :  { %3105 = vmatmul.mubr.msk.bf16.gmra.mxu1 %vm374_vm3, %v341_v57  ;;  %v691_v57 = vpack.i.b16 %v689_v55, %v689_v55 }
 0x1d6   :  { %v696_v60 = vrot.slane %v691_v57, %v3849_v31 }
 0x27c   :  { %v3094_v1 = vpop.f32.mrf.mxu1 }
 0x27e   :  { %v433_v4 = vpop.f32.mrf.mxu1 }
 0x280   :  { %v3095_v5 = vpop.f32.mrf.mxu1 }
 0x281   :  { %v497_v7 = vpack.c.bf16 %v3095_v5, %v3094_v1 }
 0x282   :  { %v436_v8 = vpop.f32.mrf.mxu1 }
 0x283   :  { %v496_v9 = vpack.c.bf16 %v436_v8, %v433_v4  ;;  %v513_v10 = vadd.bf16 %v511_v6, %v497_v7 }
 0x284   :  { %v3098_v11 = vpop.f32.mrf.mxu1 }
 0x285   :  { %v512_v12 = vadd.bf16 %v511_v6, %v496_v9  ;;  %v521_v15 = vmax.bf16 %v3698_v35, %v513_v10 }
 0x286   :  { %v449_v13 = vpop.f32.mrf.mxu1 }
 0x287   :  { %v520_v14 = vmax.bf16 %v3698_v35, %v512_v12 }
 0x288   :  { %v3099_v16 = vpop.f32.mrf.mxu1 }
 0x289   :  { %v499_v17 = vpack.c.bf16 %v3099_v16, %v3098_v11  ;;  %3116 = vmatprep.mubr.msk.bf16.mxu0 %vm374_vm3, %v520_v14 }
 0x28a   :  { %v452_v18 = vpop.f32.mrf.mxu1  ;;  %3117 = vmatmul.mubr.msk.bf16.vlgmr.msra.gmra.mxu0 %vm374_vm3, %v521_v15 }
 0x28b   :  { %v498_v19 = vpack.c.bf16 %v452_v18, %v449_v13  ;;  %v515_v20 = vadd.bf16 %v511_v6, %v499_v17  ;;  %3157 = vmatpush3.bf16.msra.mxu0 %v3341_v51 }
 0x28c   :  { %v3102_v21 = vpop.f32.mrf.mxu1  ;;  %3158 = vmatprep.subr.bf16.mxu0 %v3342_v52 }
 0x28d   :  { %v514_v22 = vadd.bf16 %v511_v6, %v498_v19  ;;  %v523_v25 = vmax.bf16 %v3698_v35, %v515_v20 }
 0x28e   :  { %v465_v23 = vpop.f32.mrf.mxu1 }
 0x28f   :  { %v522_v24 = vmax.bf16 %v3698_v35, %v514_v22  ;;  %3159 = vmatpush3.bf16.msra.mxu0 %v3342_v52 }
 0x290   :  { %v3103_v26 = vpop.f32.mrf.mxu1  ;;  %3160 = vmatprep.subr.bf16.mxu0 %v3343_v53 }
 0x291   :  { %v501_v27 = vpack.c.bf16 %v3103_v26, %v3102_v21  ;;  %3120 = vmatprep.mubr.msk.bf16.mxu0 %vm374_vm3, %v522_v24 }
 0x292   :  { %v468_v29 = vpop.f32.mrf.mxu1  ;;  %3121 = vmatmul.mubr.msk.bf16.gmra.mxu0 %vm374_vm3, %v523_v25 }
 0x293   :  { %v500_v30 = vpack.c.bf16 %v468_v29, %v465_v23  ;;  %v517_v32 = vadd.bf16 %v511_v6, %v501_v27  ;;  %3161 = vmatpush3.bf16.msra.mxu0 %v3343_v53 }
 0x294   :  { %v3106_v33 = vpop.f32.mrf.mxu1  ;;  %3162 = vmatprep.subr.bf16.mxu0 %v3344_v3 }
 0x295   :  { %v516_v34 = vadd.bf16 %v511_v6, %v500_v30  ;;  %v525_v38 = vmax.bf16 %v3698_v35, %v517_v32 }
 0x296   :  { %v481_v36 = vpop.f32.mrf.mxu1 }
 0x297   :  { %v524_v37 = vmax.bf16 %v3698_v35, %v516_v34  ;;  %3163 = vmatpush3.bf16.msra.mxu0 %v3344_v3 }
 0x298   :  { %v3107_v39 = vpop.f32.mrf.mxu1  ;;  %3164 = vmatprep.subr.bf16.mxu0 %v3345_v54 }
 0x299   :  { %v503_v40 = vpack.c.bf16 %v3107_v39, %v3106_v33  ;;  %3124 = vmatprep.mubr.msk.bf16.mxu0 %vm374_vm3, %v524_v37  ;;  %v3337_v37 = vld [vmem:[%s4078_s1] sm:$0xff]   ;;  %v3338_v39 = vld [vmem:[%s4078_s1 + $0x8] sm:$0xff]  }
 0x29a   :  { %v484_v41 = vpop.f32.mrf.mxu1  ;;  %3125 = vmatmul.mubr.msk.bf16.gmra.mxu0 %vm374_vm3, %v525_v38 }
 0x29b   :  { %v502_v42 = vpack.c.bf16 %v484_v41, %v481_v36  ;;  %v519_v43 = vadd.bf16 %v511_v6, %v503_v40  ;;  %3165 = vmatpush3.bf16.msra.mxu0 %v3345_v54  ;;  %v3339_v40 = vld [vmem:[%s4078_s1 + $0x10] sm:$0xff]   ;;  %v3340_v41 = vld [vmem:[%s4078_s1 + $0x18] sm:$0xff]  }
 0x29d   :  { %v518_v44 = vadd.bf16 %v511_v6, %v502_v42  ;;  %v527_v46 = vmax.bf16 %v3698_v35, %v519_v43  ;;  %v3346_v42 = vld [vmem:[%s4086_s9 + $0x10] sm:$0xff]   ;;  %v3347_v43 = vld [vmem:[%s4086_s9 + $0x8] sm:$0xff]  }
 0x29e   :  { %3166 = vmatprep.subr.bf16.mxu0 %v3346_v42 }
 0x29f   :  { %v526_v45 = vmax.bf16 %v3698_v35, %v518_v44  ;;  %3167 = vmatpush3.bf16.msra.mxu0 %v3346_v42  ;;  %v3348_v44 = vld [vmem:[%s4086_s9] sm:$0xff]  }
 0x2a0   :  { %3168 = vmatprep.subr.bf16.mxu0 %v3347_v43 }
 0x2a1   :  { %3128 = vmatprep.mubr.msk.bf16.mxu0 %vm374_vm3, %v526_v45  ;;  %v3349_v45 = vld [vmem:[#allocation6 + $0x18] sm:$0xff]  }
 0x2a2   :  { %3129 = vmatmul.mubr.msk.bf16.gmra.mxu0 %vm374_vm3, %v527_v46  ;;  %v874_v46 = vld [vmem:[#allocation14] sm:$0x1] }
 0x2a3   :  { %3169 = vmatpush3.bf16.msra.mxu0 %v3347_v43  ;;  %v876_v48 = vpack.i.b16 %v874_v46, %v874_v46  ;;  %v3699_v43 = vmov -inf  }
 0x2a4   :  { %3170 = vmatprep.subr.bf16.mxu0 %v3348_v44  ;;  %182 = vst [vmem:[#allocation2] sm:$0x3] %v3699_v43 }
 0x2a5   :  { %v881_v51 = vrot.slane %v876_v48, %v3849_v31 }
 0x2a7   :  { %3171 = vmatpush3.bf16.msra.mxu0 %v3348_v44  ;;  %v1243_v44 = vld [vmem:[#allocation3] sm:$0x1] }
 0x2a8   :  { %3198 = vmatprep.subr.bf16.mxu0 %v3349_v45 }
 0x34a   :  { %v3118_v56 = vpop.f32.mrf.mxu0 }
 0x34c   :  { %v618_v58 = vpop.f32.mrf.mxu0 }
 0x34e   :  { %v3119_v59 = vpop.f32.mrf.mxu0 }
 0x34f   :  { %v682_v61 = vpack.c.bf16 %v3119_v59, %v3118_v56 }
 0x350   :  { %v621_v62 = vpop.f32.mrf.mxu0 }
 0x351   :  { %v681_v63 = vpack.c.bf16 %v621_v62, %v618_v58  ;;  %v698_v0 = vadd.bf16 %v696_v60, %v682_v61  ;;  %v3350_v61 = vld [vmem:[#allocation6 + $0x10] sm:$0xff]  }
 0x352   :  { %v3122_v1 = vpop.f32.mrf.mxu0 }
 0x353   :  { %v697_v2 = vadd.bf16 %v696_v60, %v681_v63  ;;  %v706_v6 = vmax.bf16 %v3698_v35, %v698_v0 }
 0x354   :  { %v634_v4 = vpop.f32.mrf.mxu0 }
 0x355   :  { %v705_v5 = vmax.bf16 %v3698_v35, %v697_v2 }
 0x356   :  { %v3123_v7 = vpop.f32.mrf.mxu0 }
 0x357   :  { %v684_v8 = vpack.c.bf16 %v3123_v7, %v3122_v1  ;;  %3140 = vmatprep.mubr.msk.bf16.mxu1 %vm374_vm3, %v705_v5 }
 0x358   :  { %v637_v9 = vpop.f32.mrf.mxu0  ;;  %3141 = vmatmul.mubr.msk.bf16.vlgmr.msra.gmra.mxu1 %vm374_vm3, %v706_v6 }
 0x359   :  { %v683_v10 = vpack.c.bf16 %v637_v9, %v634_v4  ;;  %3189 = vmatpush3.bf16.msra.mxu1 %v1156_v49  ;;  %v700_v11 = vadd.bf16 %v696_v60, %v684_v8  ;;  %v3351_v4 = vld [vmem:[#allocation6 + $0x8] sm:$0xff]  }
 0x35a   :  { %v3126_v12 = vpop.f32.mrf.mxu0 }
 0x35b   :  { %v699_v13 = vadd.bf16 %v696_v60, %v683_v10  ;;  %v708_v16 = vmax.bf16 %v3698_v35, %v700_v11  ;;  %v3352_v10 = vld [vmem:[#allocation6] sm:$0xff]  }
 0x35c   :  { %v650_v14 = vpop.f32.mrf.mxu0 }
 0x35d   :  { %v707_v15 = vmax.bf16 %v3698_v35, %v699_v13 }
 0x35e   :  { %v3127_v17 = vpop.f32.mrf.mxu0 }
 0x35f   :  { %v686_v18 = vpack.c.bf16 %v3127_v17, %v3126_v12  ;;  %3144 = vmatprep.mubr.msk.bf16.mxu1 %vm374_vm3, %v707_v15 }
 0x360   :  { %v653_v19 = vpop.f32.mrf.mxu0  ;;  %3145 = vmatmul.mubr.msk.bf16.gmra.mxu1 %vm374_vm3, %v708_v16 }
 0x361   :  { %v685_v20 = vpack.c.bf16 %v653_v19, %v650_v14  ;;  %v702_v21 = vadd.bf16 %v696_v60, %v686_v18 }
 0x362   :  { %v3130_v22 = vpop.f32.mrf.mxu0 }
 0x363   :  { %v701_v23 = vadd.bf16 %v696_v60, %v685_v20  ;;  %v710_v26 = vmax.bf16 %v3698_v35, %v702_v21 }
 0x364   :  { %v666_v24 = vpop.f32.mrf.mxu0 }
 0x365   :  { %v709_v25 = vmax.bf16 %v3698_v35, %v701_v23 }
 0x366   :  { %v3131_v27 = vpop.f32.mrf.mxu0 }
 0x367   :  { %v688_v29 = vpack.c.bf16 %v3131_v27, %v3130_v22  ;;  %3148 = vmatprep.mubr.msk.bf16.mxu1 %vm374_vm3, %v709_v25 }
 0x368   :  { %v669_v30 = vpop.f32.mrf.mxu0  ;;  %3149 = vmatmul.mubr.msk.bf16.gmra.mxu1 %vm374_vm3, %v710_v26 }
 0x369   :  { %v687_v32 = vpack.c.bf16 %v669_v30, %v666_v24  ;;  %v704_v33 = vadd.bf16 %v696_v60, %v688_v29 }
 0x36b   :  { %v703_v34 = vadd.bf16 %v696_v60, %v687_v32  ;;  %v712_v38 = vmax.bf16 %v3698_v35, %v704_v33 }
 0x36d   :  { %v711_v36 = vmax.bf16 %v3698_v35, %v703_v34 }
 0x36f   :  { %3152 = vmatprep.mubr.msk.bf16.mxu1 %vm374_vm3, %v711_v36 }
 0x370   :  { %3153 = vmatmul.mubr.msk.bf16.gmra.mxu1 %vm374_vm3, %v712_v38 }
 0x371   :  { %3190 = vmatprep.mubr.msk.bf16.mxu1 %vm213_vm2, %v3337_v37 }
 0x378   :  { %3191 = vmatmul.mubr.msk.bf16.vlgmr.msra.gmra.mxu1 %vm213_vm2, %v3338_v39 }
 0x379   :  { %3194 = vmatprep.mubr.msk.bf16.mxu1 %vm213_vm2, %v3339_v40 }
 0x380   :  { %3195 = vmatmul.mubr.msk.bf16.gmra.mxu1 %vm213_vm2, %v3340_v41 }
 0x418   :  { %v3142_v47 = vpop.f32.mrf.mxu1 }
 0x41a   :  { %v803_v49 = vpop.f32.mrf.mxu1 }
 0x41c   :  { %v3143_v50 = vpop.f32.mrf.mxu1 }
 0x41d   :  { %v867_v52 = vpack.c.bf16 %v3143_v50, %v3142_v47 }
 0x41e   :  { %v806_v53 = vpop.f32.mrf.mxu1 }
 0x41f   :  { %v866_v3 = vpack.c.bf16 %v806_v53, %v803_v49  ;;  %v883_v54 = vadd.bf16 %v881_v51, %v867_v52 }
 0x420   :  { %v3146_v55 = vpop.f32.mrf.mxu1 }
 0x421   :  { %v882_v56 = vadd.bf16 %v881_v51, %v866_v3  ;;  %v891_v59 = vmax.bf16 %v3698_v35, %v883_v54 }
 0x422   :  { %v819_v57 = vpop.f32.mrf.mxu1 }
 0x423   :  { %v890_v58 = vmax.bf16 %v3698_v35, %v882_v56 }
 0x424   :  { %v3147_v60 = vpop.f32.mrf.mxu1 }
 0x425   :  { %v869_v62 = vpack.c.bf16 %v3147_v60, %v3146_v55  ;;  %3172 = vmatprep.mubr.bf16.mxu0 %v890_v58 }
 0x426   :  { %v822_v63 = vpop.f32.mrf.mxu1  ;;  %3173 = vmatmul.mubr.bf16.vlgmr.msra.gmra.mxu0 %v891_v59 }
 0x427   :  { %v868_v0 = vpack.c.bf16 %v822_v63, %v819_v57  ;;  %3199 = vmatpush3.bf16.msra.mxu0 %v3349_v45  ;;  %v885_v1 = vadd.bf16 %v881_v51, %v869_v62  ;;  %v1245_v45 = vpack.i.b16 %v1243_v44, %v1243_v44 }
 0x428   :  { %v3150_v2 = vpop.f32.mrf.mxu1  ;;  %3200 = vmatprep.subr.bf16.mxu0 %v3350_v61 }
 0x429   :  { %v884_v5 = vadd.bf16 %v881_v51, %v868_v0  ;;  %v893_v9 = vmax.bf16 %v3698_v35, %v885_v1  ;;  %v1250_v46 = vrot.slane %v1245_v45, %v3849_v31 }
 0x42a   :  { %v835_v6 = vpop.f32.mrf.mxu1 }
 0x42b   :  { %v892_v7 = vmax.bf16 %v3698_v35, %v884_v5  ;;  %3201 = vmatpush3.bf16.msra.mxu0 %v3350_v61 }
 0x42c   :  { %v3151_v8 = vpop.f32.mrf.mxu1  ;;  %3202 = vmatprep.subr.bf16.mxu0 %v3351_v4 }
 0x42d   :  { %v871_v11 = vpack.c.bf16 %v3151_v8, %v3150_v2  ;;  %3176 = vmatprep.mubr.bf16.mxu0 %v892_v7 }
 0x42e   :  { %v838_v12 = vpop.f32.mrf.mxu1  ;;  %3177 = vmatmul.mubr.bf16.gmra.mxu0 %v893_v9 }
 0x42f   :  { %v870_v13 = vpack.c.bf16 %v838_v12, %v835_v6  ;;  %3203 = vmatpush3.bf16.msra.mxu0 %v3351_v4  ;;  %v887_v14 = vadd.bf16 %v881_v51, %v871_v11  ;;  %v3354_v12 = vld [vmem:[#allocation9 + $0x10] sm:$0xff]  }
 0x430   :  { %v3154_v15 = vpop.f32.mrf.mxu1  ;;  %3204 = vmatprep.subr.bf16.mxu0 %v3352_v10 }
 0x431   :  { %v886_v16 = vadd.bf16 %v881_v51, %v870_v13  ;;  %v895_v20 = vmax.bf16 %v3698_v35, %v887_v14 }
 0x432   :  { %v851_v17 = vpop.f32.mrf.mxu1 }
 0x433   :  { %v894_v18 = vmax.bf16 %v3698_v35, %v886_v16  ;;  %3205 = vmatpush3.bf16.msra.mxu0 %v3352_v10 }
 0x434   :  { %v3155_v19 = vpop.f32.mrf.mxu1 }
 0x435   :  { %v873_v21 = vpack.c.bf16 %v3155_v19, %v3154_v15  ;;  %3180 = vmatprep.mubr.bf16.mxu0 %v894_v18  ;;  %v3355_v15 = vld [vmem:[#allocation9 + $0x8] sm:$0xff]   ;;  %v3356_v18 = vld [vmem:[#allocation9] sm:$0xff]  }
 0x436   :  { %v854_v22 = vpop.f32.mrf.mxu1  ;;  %3181 = vmatmul.mubr.bf16.gmra.mxu0 %v895_v20  ;;  %v1067_v20 = vld [vmem:[#allocation15] sm:$0x1] }
 0x437   :  { %v872_v23 = vpack.c.bf16 %v854_v22, %v851_v17  ;;  %v889_v24 = vadd.bf16 %v881_v51, %v873_v21 }
 0x438   :  { %v3192_v25 = vpop.f32.mrf.mxu1 }
 0x439   :  { %v888_v26 = vadd.bf16 %v881_v51, %v872_v23  ;;  %v897_v32 = vmax.bf16 %v3698_v35, %v889_v24  ;;  %v3353_v51 = vld [vmem:[#allocation9 + $0x18] sm:$0xff]   ;;  %v1069_v23 = vpack.i.b16 %v1067_v20, %v1067_v20 }
 0x43a   :  { %v1192_v27 = vpop.f32.mrf.mxu1  ;;  %3222 = vmatprep.subr.bf16.mxu1 %v3353_v51 }
 0x43b   :  { %v896_v29 = vmax.bf16 %v3698_v35, %v888_v26  ;;  %3223 = vmatpush3.bf16.msra.mxu1 %v3353_v51 }
 0x43c   :  { %v3193_v30 = vpop.f32.mrf.mxu1  ;;  %3224 = vmatprep.subr.bf16.mxu1 %v3354_v12 }
 0x43d   :  { %3184 = vmatprep.mubr.bf16.mxu0 %v896_v29  ;;  %v1224_v38 = vpack.c.bf16 %v3193_v30, %v3192_v25 }
 0x43e   :  { %3185 = vmatmul.mubr.bf16.gmra.mxu0 %v897_v32  ;;  %v1195_v33 = vpop.f32.mrf.mxu1 }
 0x43f   :  { %v1223_v34 = vpack.c.bf16 %v1195_v33, %v1192_v27  ;;  %3225 = vmatpush3.bf16.msra.mxu1 %v3354_v12  ;;  %v1074_v27 = vrot.slane %v1069_v23, %v3849_v31 }
 0x440   :  { %v3196_v36 = vpop.f32.mrf.mxu1  ;;  %3226 = vmatprep.subr.bf16.mxu1 %v3355_v15 }
 0x441   :  { %1227 = vxpose.xlu1.c.b16.start [1/4] (short) %v1223_v34, 128 }
 0x442   :  { %v1208_v37 = vpop.f32.mrf.mxu1 }
 0x443   :  { %3227 = vmatpush3.bf16.msra.mxu1 %v3355_v15 }
 0x444   :  { %v3197_v39 = vpop.f32.mrf.mxu1  ;;  %3228 = vmatprep.subr.bf16.mxu1 %v3356_v18 }
 0x445   :  { %1228 = vxpose.xlu1.c.b16.cont [2/4] (short) %v1224_v38, 128  ;;  %v1226_v42 = vpack.c.bf16 %v3197_v39, %v3196_v36 }
 0x446   :  { %v1211_v40 = vpop.f32.mrf.mxu1 }
 0x447   :  { %v1225_v41 = vpack.c.bf16 %v1211_v40, %v1208_v37  ;;  %3229 = vmatpush3.bf16.msra.mxu1 %v3356_v18 }
 0x449   :  { %1229 = vxpose.xlu1.c.b16.cont [3/4] (short) %v1225_v41, 128 }
 0x44d   :  { %1230 = vxpose.xlu1.c.b16.end [4/4] (short) %v1226_v42, 128 }
 0x4a3   :  { %v1235_v47 = vpop.trf.xlu1 }
 0x4a4   :  { %v1251_v48 = vadd.bf16 %v1250_v46, %v1235_v47 }
 0x4a6   :  { %v1259_v49 = vmax.bf16 %v3698_v35, %v1251_v48 }
 0x4a7   :  { %v1236_v50 = vpop.trf.xlu1 }
 0x4a8   :  { %v1252_v52 = vadd.bf16 %v1250_v46, %v1236_v50  ;;  %3206 = vmatprep.mubr.msk.bf16.mxu0 %vm374_vm3, %v1259_v49 }
 0x4aa   :  { %v1260_v53 = vmax.bf16 %v3698_v35, %v1252_v52 }
 0x4ab   :  { %v1237_v3 = vpop.trf.xlu1 }
 0x4ac   :  { %v1253_v54 = vadd.bf16 %v1250_v46, %v1237_v3  ;;  %3207 = vmatmul.mubr.msk.bf16.vlgmr.msra.gmra.mxu0 %vm374_vm3, %v1260_v53 }
 0x4ae   :  { %v1261_v55 = vmax.bf16 %v3698_v35, %v1253_v54 }
 0x4af   :  { %v1238_v56 = vpop.trf.xlu1 }
 0x4b0   :  { %v1254_v57 = vadd.bf16 %v1250_v46, %v1238_v56  ;;  %3210 = vmatprep.mubr.msk.bf16.mxu0 %vm374_vm3, %v1261_v55 }
 0x4b2   :  { %v1262_v58 = vmax.bf16 %v3698_v35, %v1254_v57 }
 0x4b3   :  { %v1239_v59 = vpop.trf.xlu1 }
 0x4b4   :  { %v1255_v60 = vadd.bf16 %v1250_v46, %v1239_v59  ;;  %3211 = vmatmul.mubr.msk.bf16.gmra.mxu0 %vm374_vm3, %v1262_v58 }
 0x4b6   :  { %v1263_v61 = vmax.bf16 %v3698_v35, %v1255_v60 }
 0x4b7   :  { %v1240_v62 = vpop.trf.xlu1 }
 0x4b8   :  { %v1256_v63 = vadd.bf16 %v1250_v46, %v1240_v62  ;;  %3214 = vmatprep.mubr.msk.bf16.mxu0 %vm374_vm3, %v1263_v61 }
 0x4ba   :  { %v1264_v0 = vmax.bf16 %v3698_v35, %v1256_v63 }
 0x4bb   :  { %v1241_v1 = vpop.trf.xlu1 }
 0x4bc   :  { %v1257_v2 = vadd.bf16 %v1250_v46, %v1241_v1  ;;  %3215 = vmatmul.mubr.msk.bf16.gmra.mxu0 %vm374_vm3, %v1264_v0  ;;  %v3357_v1 = vld [vmem:[#allocation12 + $0x18] sm:$0xff]  }
 0x4bd   :  { %3246 = vmatprep.subr.bf16.mxu0 %v3357_v1 }
 0x4be   :  { %v1265_v4 = vmax.bf16 %v3698_v35, %v1257_v2  ;;  %v3358_v2 = vld [vmem:[#allocation12 + $0x10] sm:$0xff]   ;;  %3247 = vmatpush3.bf16.msra.mxu0 %v3357_v1  ;;  %v3364_v1 = vld [vmem:[%s4086_s9 + $0x20] sm:$0xff]  }
 0x4bf   :  { %v1242_v5 = vpop.trf.xlu1  ;;  %3248 = vmatprep.subr.bf16.mxu0 %v3358_v2 }
 0x4c0   :  { %v1258_v6 = vadd.bf16 %v1250_v46, %v1242_v5  ;;  %3218 = vmatprep.mubr.msk.bf16.mxu0 %vm374_vm3, %v1265_v4 }
 0x4c2   :  { %v1266_v7 = vmax.bf16 %v3698_v35, %v1258_v6  ;;  %v3359_v6 = vld [vmem:[#allocation12 + $0x8] sm:$0xff]   ;;  %3249 = vmatpush3.bf16.msra.mxu0 %v3358_v2  ;;  %v3365_v2 = vld [vmem:[%s4086_s9 + $0x18] sm:$0xff]  }
 0x4c3   :  { %3250 = vmatprep.subr.bf16.mxu0 %v3359_v6 }
 0x4c4   :  { %3219 = vmatmul.mubr.msk.bf16.gmra.mxu0 %vm374_vm3, %v1266_v7 }
 0x4c6   :  { %3251 = vmatpush3.bf16.msra.mxu0 %v3359_v6 }
 0x4e6   :  { %v3174_v8 = vpop.f32.mrf.mxu0 }
 0x4e8   :  { %v996_v9 = vpop.f32.mrf.mxu0 }
 0x4ea   :  { %v3175_v10 = vpop.f32.mrf.mxu0 }
 0x4eb   :  { %v1060_v32 = vpack.c.bf16 %v3175_v10, %v3174_v8 }
 0x4ec   :  { %v999_v11 = vpop.f32.mrf.mxu0 }
 0x4ed   :  { %v1059_v29 = vpack.c.bf16 %v999_v11, %v996_v9  ;;  %v1076_v42 = vadd.bf16 %v1074_v27, %v1060_v32 }
 0x4ee   :  { %v3178_v13 = vpop.f32.mrf.mxu0 }
 0x4ef   :  { %v1075_v39 = vadd.bf16 %v1074_v27, %v1059_v29  ;;  %v1084_v53 = vmax.bf16 %v3698_v35, %v1076_v42 }
 0x4f0   :  { %v1012_v14 = vpop.f32.mrf.mxu0 }
 0x4f1   :  { %v1083_v49 = vmax.bf16 %v3698_v35, %v1075_v39 }
 0x4f2   :  { %v3179_v16 = vpop.f32.mrf.mxu0 }
 0x4f3   :  { %v1062_v33 = vpack.c.bf16 %v3179_v16, %v3178_v13  ;;  %v1109_v13 = vld [vmem:[#allocation2] sm:$0x1]  ;;  %v1428_v16 = vld [vmem:[#allocation8] sm:$0x1] }
 0x4f4   :  { %v1015_v17 = vpop.f32.mrf.mxu0  ;;  %v1430_v18 = vpack.i.b16 %v1428_v16, %v1428_v16 }
 0x4f5   :  { %v1061_v36 = vpack.c.bf16 %v1015_v17, %v1012_v14  ;;  %v1078_v43 = vadd.bf16 %v1074_v27, %v1062_v33 }
 0x4f6   :  { %v3182_v19 = vpop.f32.mrf.mxu0 }
 0x4f7   :  { %v1077_v45 = vadd.bf16 %v1074_v27, %v1061_v36  ;;  %v1086_v3 = vmax.bf16 %v3698_v35, %v1078_v43 }
 0x4f8   :  { %v1028_v21 = vpop.f32.mrf.mxu0 }
 0x4f9   :  { %v1085_v54 = vmax.bf16 %v3698_v35, %v1077_v45 }
 0x4fa   :  { %v3183_v22 = vpop.f32.mrf.mxu0 }
 0x4fb   :  { %v1064_v30 = vpack.c.bf16 %v3183_v22, %v3182_v19 }
 0x4fc   :  { %v1031_v24 = vpop.f32.mrf.mxu0 }
 0x4fd   :  { %v1063_v25 = vpack.c.bf16 %v1031_v24, %v1028_v21  ;;  %v1080_v40 = vadd.bf16 %v1074_v27, %v1064_v30  ;;  %v1435_v21 = vrot.slane %v1430_v18, %v3849_v31 }
 0x4fe   :  { %v3186_v26 = vpop.f32.mrf.mxu0 }
 0x4ff   :  { %v1079_v37 = vadd.bf16 %v1074_v27, %v1063_v25  ;;  %v1088_v50 = vmax.bf16 %v3698_v35, %v1080_v40 }
 0x500   :  { %v1044_v34 = vpop.f32.mrf.mxu0 }
 0x501   :  { %v1087_v46 = vmax.bf16 %v3698_v35, %v1079_v37  ;;  %v1092_v57 = vmax.bf16 %v1088_v50, %v1084_v53 }
 0x502   :  { %v3187_v38 = vpop.f32.mrf.mxu0 }
 0x503   :  { %v1066_v41 = vpack.c.bf16 %v3187_v38, %v3186_v26  ;;  %v1091_v55 = vmax.bf16 %v1087_v46, %v1083_v49 }
 0x504   :  { %v1047_v44 = vpop.f32.mrf.mxu0 }
 0x505   :  { %v1082_v47 = vadd.bf16 %v1074_v27, %v1066_v41  ;;  %v1065_v48 = vpack.c.bf16 %v1047_v44, %v1044_v34  ;;  %v1095_v60 = vmax.bf16 %v1092_v57, %v1091_v55 }
 0x507   :  { %v1090_v51 = vmax.bf16 %v3698_v35, %v1082_v47  ;;  %v1081_v52 = vadd.bf16 %v1074_v27, %v1065_v48 }
 0x509   :  { %v1089_v56 = vmax.bf16 %v3698_v35, %v1081_v52  ;;  %v1094_v58 = vmax.bf16 %v1090_v51, %v1086_v3 }
 0x50b   :  { %v1093_v59 = vmax.bf16 %v1089_v56, %v1085_v54 }
 0x50d   :  { %v1096_v61 = vmax.bf16 %v1094_v58, %v1093_v59 }
 0x50f   :  { %v1097_v62 = vmax.bf16 %v1096_v61, %v1095_v60  ;;  %v3360_v61 = vld [vmem:[#allocation12] sm:$0xff]  }
 0x510   :  { %3252 = vmatprep.subr.bf16.mxu0 %v3360_v61 }
 0x511   :  { %v1098_v63 = vunpack.i.l.bf16 %v1097_v62  ;;  %v1099_v0 = vunpack.i.h.bf16 %v1097_v62  ;;  %3253 = vmatpush3.bf16.msra.mxu0 %v3360_v61  ;;  %v3361_v62 = vld [vmem:[%s4086_s9 + $0x38] sm:$0xff]  }
 0x512   :  { %3270 = vmatprep.subr.bf16.mxu1 %v3361_v62 }
 0x513   :  { %v1100_v4 = vmax.f32 %v1098_v63, %v1099_v0  ;;  %v3362_v63 = vld [vmem:[%s4086_s9 + $0x30] sm:$0xff]   ;;  %v3363_v0 = vld [vmem:[%s4086_s9 + $0x28] sm:$0xff]  }
 0x515   :  { %v1101_v5 = vrot.slane %v1100_v4, 4 }
 0x517   :  { %v1102_v7 = vmax.f32 %v1100_v4, %v1101_v5  ;;  %v1613_v4 = vld [vmem:[#allocation11] sm:$0x1] }
 0x518   :  { %v1615_v6 = vpack.i.b16 %v1613_v4, %v1613_v4 }
 0x519   :  { %v1103_v8 = vrot.slane %v1102_v7, 2 }
 0x51b   :  { %v1104_v9 = vmax.f32 %v1102_v7, %v1103_v8 }
 0x51d   :  { %v1105_v10 = vrot.slane %v1104_v9, 1 }
 0x51f   :  { %v1106_v11 = vmax.f32 %v1104_v9, %v1105_v10  ;;  %v1620_v9 = vrot.slane %v1615_v6, %v3849_v31 }
 0x521   :  { %v1107_v12 = vpack.i.bf16 %v1106_v11, %v1106_v11 }
 0x523   :  { %v1108_v14 = vunpack.c.l.bf16 %v1107_v12 }
 0x525   :  { %v1110_v15 = vmax.f32 %v1109_v13, %v1108_v14 }
 0x527   :  { %1111 = vst [vmem:[#allocation2] sm:$0x1] %v1110_v15 }
 0x56c   :  { %v3208_v17 = vpop.f32.mrf.mxu0 }
 0x56e   :  { %v1357_v19 = vpop.f32.mrf.mxu0 }
 0x570   :  { %v3209_v20 = vpop.f32.mrf.mxu0 }
 0x571   :  { %v1421_v22 = vpack.c.bf16 %v3209_v20, %v3208_v17 }
 0x572   :  { %v1360_v23 = vpop.f32.mrf.mxu0 }
 0x573   :  { %v1420_v24 = vpack.c.bf16 %v1360_v23, %v1357_v19  ;;  %v1437_v25 = vadd.bf16 %v1435_v21, %v1421_v22 }
 0x574   :  { %v3212_v26 = vpop.f32.mrf.mxu0 }
 0x575   :  { %v1436_v27 = vadd.bf16 %v1435_v21, %v1420_v24  ;;  %v1445_v32 = vmax.bf16 %v3698_v35, %v1437_v25 }
 0x576   :  { %v1373_v29 = vpop.f32.mrf.mxu0 }
 0x577   :  { %v1444_v30 = vmax.bf16 %v3698_v35, %v1436_v27 }
 0x578   :  { %v3213_v33 = vpop.f32.mrf.mxu0 }
 0x579   :  { %v1423_v34 = vpack.c.bf16 %v3213_v33, %v3212_v26  ;;  %3230 = vmatprep.mubr.msk.bf16.mxu1 %vm374_vm3, %v1444_v30 }
 0x57a   :  { %v1376_v36 = vpop.f32.mrf.mxu0  ;;  %3231 = vmatmul.mubr.msk.bf16.vlgmr.msra.gmra.mxu1 %vm374_vm3, %v1445_v32 }
 0x57b   :  { %v1422_v37 = vpack.c.bf16 %v1376_v36, %v1373_v29  ;;  %v1439_v38 = vadd.bf16 %v1435_v21, %v1423_v34  ;;  %3271 = vmatpush3.bf16.msra.mxu1 %v3361_v62 }
 0x57c   :  { %v3216_v39 = vpop.f32.mrf.mxu0  ;;  %3272 = vmatprep.subr.bf16.mxu1 %v3362_v63 }
 0x57d   :  { %v1438_v40 = vadd.bf16 %v1435_v21, %v1422_v37  ;;  %v1447_v43 = vmax.bf16 %v3698_v35, %v1439_v38 }
 0x57e   :  { %v1389_v41 = vpop.f32.mrf.mxu0 }
 0x57f   :  { %v1446_v42 = vmax.bf16 %v3698_v35, %v1438_v40  ;;  %3273 = vmatpush3.bf16.msra.mxu1 %v3362_v63 }
 0x580   :  { %v3217_v44 = vpop.f32.mrf.mxu0  ;;  %3274 = vmatprep.subr.bf16.mxu1 %v3363_v0 }
 0x581   :  { %v1425_v45 = vpack.c.bf16 %v3217_v44, %v3216_v39  ;;  %3234 = vmatprep.mubr.msk.bf16.mxu1 %vm374_vm3, %v1446_v42 }
 0x582   :  { %v1392_v46 = vpop.f32.mrf.mxu0  ;;  %3235 = vmatmul.mubr.msk.bf16.gmra.mxu1 %vm374_vm3, %v1447_v43 }
 0x583   :  { %v1424_v47 = vpack.c.bf16 %v1392_v46, %v1389_v41  ;;  %v1441_v48 = vadd.bf16 %v1435_v21, %v1425_v45  ;;  %3275 = vmatpush3.bf16.msra.mxu1 %v3363_v0 }
 0x584   :  { %v3220_v49 = vpop.f32.mrf.mxu0  ;;  %3276 = vmatprep.subr.bf16.mxu1 %v3364_v1 }
 0x585   :  { %v1440_v50 = vadd.bf16 %v1435_v21, %v1424_v47  ;;  %v1449_v53 = vmax.bf16 %v3698_v35, %v1441_v48 }
 0x586   :  { %v1405_v51 = vpop.f32.mrf.mxu0 }
 0x587   :  { %v1448_v52 = vmax.bf16 %v3698_v35, %v1440_v50  ;;  %3277 = vmatpush3.bf16.msra.mxu1 %v3364_v1  ;;  %v3366_v50 = vld [vmem:[%s4086_s9 + $0x10] sm:$0xff]  }
 0x588   :  { %v3221_v3 = vpop.f32.mrf.mxu0  ;;  %3278 = vmatprep.subr.bf16.mxu1 %v3365_v2 }
 0x589   :  { %v1427_v54 = vpack.c.bf16 %v3221_v3, %v3220_v49  ;;  %3238 = vmatprep.mubr.msk.bf16.mxu1 %vm374_vm3, %v1448_v52  ;;  %v3368_v52 = vld [vmem:[%s4086_s9] sm:$0xff]  }
 0x58a   :  { %v1408_v55 = vpop.f32.mrf.mxu0  ;;  %3239 = vmatmul.mubr.msk.bf16.gmra.mxu1 %vm374_vm3, %v1449_v53  ;;  %v1798_v53 = vld [vmem:[#allocation14] sm:$0x1] }
 0x58b   :  { %v1426_v56 = vpack.c.bf16 %v1408_v55, %v1405_v51  ;;  %v1443_v57 = vadd.bf16 %v1435_v21, %v1427_v54  ;;  %3279 = vmatpush3.bf16.msra.mxu1 %v3365_v2  ;;  %v3367_v51 = vld [vmem:[%s4086_s9 + $0x8] sm:$0xff]   ;;  %v1800_v54 = vpack.i.b16 %v1798_v53, %v1798_v53 }
 0x58c   :  { %3280 = vmatprep.subr.bf16.mxu1 %v3366_v50  ;;  %v3393_v53 = vld [vmem:[#allocation17 + $0x60] ss:$16 sps:$4 sm:$0xff]  }
 0x58d   :  { %v1442_v58 = vadd.bf16 %v1435_v21, %v1426_v56  ;;  %v1451_v60 = vmax.bf16 %v3698_v35, %v1443_v57  ;;  %v1805_v57 = vrot.slane %v1800_v54, %v3849_v31  ;;  %v3401_v54 = vld [vmem:[#allocation17 + $0x44] ss:$16 sps:$4 sm:$0xff]  }
 0x58f   :  { %v1450_v59 = vmax.bf16 %v3698_v35, %v1442_v58  ;;  %3281 = vmatpush3.bf16.msra.mxu1 %v3366_v50  ;;  %v3390_v50 = vld [vmem:[#allocation17 + $0x88] ss:$16 sps:$4 sm:$0xff]  }
 0x590   :  { %3282 = vmatprep.subr.bf16.mxu1 %v3367_v51 }
 0x591   :  { %3242 = vmatprep.mubr.msk.bf16.mxu1 %vm374_vm3, %v1450_v59 }
 0x592   :  { %3243 = vmatmul.mubr.msk.bf16.gmra.mxu1 %vm374_vm3, %v1451_v60 }
 0x593   :  { %3283 = vmatpush3.bf16.msra.mxu1 %v3367_v51  ;;  %v3395_v51 = vld [vmem:[#allocation17 + $0x64] ss:$16 sps:$4 sm:$0xff]  }
 0x594   :  { %3284 = vmatprep.subr.bf16.mxu1 %v3368_v52 }
 0x597   :  { %3285 = vmatpush3.bf16.msra.mxu1 %v3368_v52  ;;  %v3398_v52 = vld [vmem:[#allocation17 + $0x6c] ss:$16 sps:$4 sm:$0xff]  }
 0x63a   :  { %v3232_v5 = vpop.f32.mrf.mxu1 }
 0x63c   :  { %v1542_v7 = vpop.f32.mrf.mxu1 }
 0x63e   :  { %v3233_v8 = vpop.f32.mrf.mxu1 }
 0x63f   :  { %v1606_v10 = vpack.c.bf16 %v3233_v8, %v3232_v5 }
 0x640   :  { %v1545_v11 = vpop.f32.mrf.mxu1 }
 0x641   :  { %v1605_v12 = vpack.c.bf16 %v1545_v11, %v1542_v7  ;;  %v1622_v13 = vadd.bf16 %v1620_v9, %v1606_v10 }
 0x642   :  { %v3236_v14 = vpop.f32.mrf.mxu1 }
 0x643   :  { %v1621_v15 = vadd.bf16 %v1620_v9, %v1605_v12  ;;  %v1630_v18 = vmax.bf16 %v3698_v35, %v1622_v13 }
 0x644   :  { %v1558_v16 = vpop.f32.mrf.mxu1 }
 0x645   :  { %v1629_v17 = vmax.bf16 %v3698_v35, %v1621_v15 }
 0x646   :  { %v3237_v19 = vpop.f32.mrf.mxu1 }
 0x647   :  { %v1608_v20 = vpack.c.bf16 %v3237_v19, %v3236_v14  ;;  %3254 = vmatprep.mubr.msk.bf16.mxu0 %vm374_vm3, %v1629_v17 }
 0x648   :  { %v1561_v21 = vpop.f32.mrf.mxu1  ;;  %3255 = vmatmul.mubr.msk.bf16.vlgmr.msra.gmra.mxu0 %vm374_vm3, %v1630_v18 }
 0x649   :  { %v1607_v22 = vpack.c.bf16 %v1561_v21, %v1558_v16  ;;  %v1624_v23 = vadd.bf16 %v1620_v9, %v1608_v20 }
 0x64a   :  { %v3240_v24 = vpop.f32.mrf.mxu1 }
 0x64b   :  { %v1623_v25 = vadd.bf16 %v1620_v9, %v1607_v22  ;;  %v1632_v29 = vmax.bf16 %v3698_v35, %v1624_v23 }
 0x64c   :  { %v1574_v26 = vpop.f32.mrf.mxu1 }
 0x64d   :  { %v1631_v27 = vmax.bf16 %v3698_v35, %v1623_v25 }
 0x64e   :  { %v3241_v30 = vpop.f32.mrf.mxu1 }
 0x64f   :  { %v1610_v32 = vpack.c.bf16 %v3241_v30, %v3240_v24  ;;  %3258 = vmatprep.mubr.msk.bf16.mxu0 %vm374_vm3, %v1631_v27 }
 0x650   :  { %v1577_v33 = vpop.f32.mrf.mxu1  ;;  %3259 = vmatmul.mubr.msk.bf16.gmra.mxu0 %vm374_vm3, %v1632_v29 }
 0x651   :  { %v1609_v34 = vpack.c.bf16 %v1577_v33, %v1574_v26  ;;  %v1626_v36 = vadd.bf16 %v1620_v9, %v1610_v32 }
 0x652   :  { %v3244_v37 = vpop.f32.mrf.mxu1 }
 0x653   :  { %v1625_v38 = vadd.bf16 %v1620_v9, %v1609_v34  ;;  %v1634_v41 = vmax.bf16 %v3698_v35, %v1626_v36  ;;  %v3371_v34 = vld [vmem:[#allocation17 + $0xe4] ss:$16 sps:$4 sm:$0xff]   ;;  %v3374_v36 = vld [vmem:[#allocation17 + $0xec] ss:$16 sps:$4 sm:$0xff]  }
 0x654   :  { %v1590_v39 = vpop.f32.mrf.mxu1  ;;  %2233 = vmatprep.subr.bf16.mxu0 %v3371_v34  ;;  %2274 = vmatprep.subr.bf16.mxu1 %v3374_v36 }
 0x655   :  { %v1633_v40 = vmax.bf16 %v3698_v35, %v1625_v38  ;;  %v3372_v38 = vld [vmem:[#allocation17 + $0xe8] ss:$16 sps:$4 sm:$0xff]  }
 0x656   :  { %v3245_v42 = vpop.f32.mrf.mxu1 }
 0x657   :  { %v1612_v43 = vpack.c.bf16 %v3245_v42, %v3244_v37  ;;  %3262 = vmatprep.mubr.msk.bf16.mxu0 %vm374_vm3, %v1633_v40  ;;  %v3369_v37 = vld [vmem:[#allocation17 + $0xe0] ss:$16 sps:$4 sm:$0xff]   ;;  %v3380_v40 = vld [vmem:[#allocation17 + $0xcc] ss:$16 sps:$4 sm:$0xff]   ;;  %v3378_v42 = vld [vmem:[#allocation17 + $0xc8] ss:$16 sps:$4 sm:$0xff]  }
 0x658   :  { %v1593_v44 = vpop.f32.mrf.mxu1  ;;  %3263 = vmatmul.mubr.msk.bf16.gmra.mxu0 %vm374_vm3, %v1634_v41  ;;  %v3375_v41 = vld [vmem:[#allocation17 + $0xc0] ss:$16 sps:$4 sm:$0xff]  }
 0x659   :  { %v1611_v45 = vpack.c.bf16 %v1593_v44, %v1590_v39  ;;  %v1628_v46 = vadd.bf16 %v1620_v9, %v1612_v43  ;;  %2234 = vmatpush1.bf16.msra.mxu0 %v3369_v37  ;;  %v3377_v39 = vld [vmem:[#allocation17 + $0xc4] ss:$16 sps:$4 sm:$0xff]   ;;  %v3386_v44 = vld [vmem:[#allocation17 + $0xac] ss:$16 sps:$4 sm:$0xff]  }
 0x65a   :  { %2235 = vmatprep.subr.bf16.mxu0 %v3377_v39  ;;  %v3383_v43 = vld [vmem:[#allocation17 + $0xa4] ss:$16 sps:$4 sm:$0xff]  }
 0x65b   :  { %v1627_v47 = vadd.bf16 %v1620_v9, %v1611_v45  ;;  %v1636_v49 = vmax.bf16 %v3698_v35, %v1628_v46  ;;  %v3381_v45 = vld [vmem:[#allocation17 + $0xa0] ss:$16 sps:$4 sm:$0xff]   ;;  %v3384_v46 = vld [vmem:[#allocation17 + $0xa8] ss:$16 sps:$4 sm:$0xff]  }
 0x65d   :  { %v1635_v48 = vmax.bf16 %v3698_v35, %v1627_v47  ;;  %2236 = vmatpush1.bf16.msra.mxu0 %v3375_v41  ;;  %v3389_v47 = vld [vmem:[#allocation17 + $0x84] ss:$16 sps:$4 sm:$0xff]  }
 0x65e   :  { %2237 = vmatprep.subr.bf16.mxu0 %v3383_v43 }
 0x65f   :  { %3266 = vmatprep.mubr.msk.bf16.mxu0 %vm374_vm3, %v1635_v48  ;;  %v3392_v48 = vld [vmem:[#allocation17 + $0x8c] ss:$16 sps:$4 sm:$0xff]  }
 0x660   :  { %3267 = vmatmul.mubr.msk.bf16.gmra.mxu0 %vm374_vm3, %v1636_v49  ;;  %v3387_v49 = vld [vmem:[#allocation17 + $0x80] ss:$16 sps:$4 sm:$0xff]  }
 0x661   :  { %2265 = vmatprep.mubr.bf16.mxu0 %v3698_v35  ;;  %2238 = vmatpush1.bf16.msra.mxu0 %v3381_v45 }
 0x662   :  { %2239 = vmatprep.subr.bf16.mxu0 %v3389_v47 }
 0x665   :  { %2240 = vmatpush1.bf16.msra.mxu0 %v3387_v49 }
 0x666   :  { %2241 = vmatprep.subr.bf16.mxu0 %v3395_v51 }
 0x669   :  { %2242 = vmatpush1.bf16.msra.mxu0 %v3393_v53 }
 0x66a   :  { %2243 = vmatprep.subr.bf16.mxu0 %v3401_v54 }
 0x708   :  { %v3256_v3 = vpop.f32.mrf.mxu0 }
 0x70a   :  { %v1727_v55 = vpop.f32.mrf.mxu0 }
 0x70c   :  { %v3257_v56 = vpop.f32.mrf.mxu0 }
 0x70d   :  { %v1791_v58 = vpack.c.bf16 %v3257_v56, %v3256_v3  ;;  %v3396_v3 = vld [vmem:[#allocation17 + $0x68] ss:$16 sps:$4 sm:$0xff]   ;;  %v3399_v56 = vld [vmem:[#allocation17 + $0x40] ss:$16 sps:$4 sm:$0xff]  }
 0x70e   :  { %v1730_v59 = vpop.f32.mrf.mxu0  ;;  %2244 = vmatpush1.bf16.msra.mxu0 %v3399_v56 }
 0x70f   :  { %v1790_v60 = vpack.c.bf16 %v1730_v59, %v1727_v55  ;;  %v1807_v61 = vadd.bf16 %v1805_v57, %v1791_v58  ;;  %v3404_v55 = vld [vmem:[#allocation17 + $0x4c] ss:$16 sps:$4 sm:$0xff]   ;;  %v3405_v58 = vld [vmem:[#allocation17 + $0x20] ss:$16 sps:$4 sm:$0xff]   ;;  %v3407_v59 = vld [vmem:[#allocation17 + $0x24] ss:$16 sps:$4 sm:$0xff]  }
 0x710   :  { %v3260_v62 = vpop.f32.mrf.mxu0  ;;  %2245 = vmatprep.subr.bf16.mxu0 %v3407_v59 }
 0x711   :  { %v1806_v63 = vadd.bf16 %v1805_v57, %v1790_v60  ;;  %v1815_v2 = vmax.bf16 %v3698_v35, %v1807_v61  ;;  %v3408_v60 = vld [vmem:[#allocation17 + $0x28] ss:$16 sps:$4 sm:$0xff]   ;;  %v3410_v61 = vld [vmem:[#allocation17 + $0x2c] ss:$16 sps:$4 sm:$0xff]  }
 0x712   :  { %v1743_v0 = vpop.f32.mrf.mxu0  ;;  %2246 = vmatpush1.bf16.msra.mxu0 %v3405_v58 }
 0x713   :  { %v1814_v1 = vmax.bf16 %v3698_v35, %v1806_v63  ;;  %v3416_v63 = vld [vmem:[#allocation17 + $0xc] ss:$16 sps:$4 sm:$0xff]  }
 0x714   :  { %v3261_v4 = vpop.f32.mrf.mxu0 }
 0x715   :  { %v1793_v5 = vpack.c.bf16 %v3261_v4, %v3260_v62  ;;  %3286 = vmatprep.mubr.bf16.mxu1 %v1814_v1  ;;  %v3413_v62 = vld [vmem:[#allocation17 + $0x4] ss:$16 sps:$4 sm:$0xff]   ;;  %v3414_v1 = vld [vmem:[#allocation17 + $0x8] ss:$16 sps:$4 sm:$0xff]  }
 0x716   :  { %v1746_v6 = vpop.f32.mrf.mxu0  ;;  %3287 = vmatmul.mubr.bf16.vlgmr.msra.gmra.mxu1 %v1815_v2  ;;  %2247 = vmatprep.subr.bf16.mxu0 %v3413_v62  ;;  %v3417_v2 = vld [vmem:[#allocation18 + $0x78] sm:$0xff]  }
 0x717   :  { %v1792_v7 = vpack.c.bf16 %v1746_v6, %v1743_v0  ;;  %v1809_v8 = vadd.bf16 %v1805_v57, %v1793_v5  ;;  %2275 = vmatpush1.bf16.msra.mxu1 %v3372_v38  ;;  %v3411_v0 = vld [vmem:[#allocation17] ss:$16 sps:$4 sm:$0xff]   ;;  %v3418_v4 = vld [vmem:[#allocation18 + $0xf8] sm:$0xff]  }
 0x718   :  { %v3264_v9 = vpop.f32.mrf.mxu0  ;;  %2276 = vmatprep.subr.bf16.mxu1 %v3380_v40  ;;  %2248 = vmatpush1.bf16.msra.mxu0 %v3411_v0 }
 0x719   :  { %v1808_v10 = vadd.bf16 %v1805_v57, %v1792_v7  ;;  %v1817_v14 = vmax.bf16 %v3698_v35, %v1809_v8  ;;  %3030 = vmatprep.subr.bf16.mxu0 %v3417_v2 }
 0x71a   :  { %v1759_v11 = vpop.f32.mrf.mxu0 }
 0x71b   :  { %v1816_v12 = vmax.bf16 %v3698_v35, %v1808_v10  ;;  %2277 = vmatpush1.bf16.msra.mxu1 %v3378_v42 }
 0x71c   :  { %v3265_v13 = vpop.f32.mrf.mxu0  ;;  %2278 = vmatprep.subr.bf16.mxu1 %v3386_v44 }
 0x71d   :  { %v1795_v15 = vpack.c.bf16 %v3265_v13, %v3264_v9  ;;  %3290 = vmatprep.mubr.bf16.mxu1 %v1816_v12 }
 0x71e   :  { %v1762_v16 = vpop.f32.mrf.mxu0  ;;  %3291 = vmatmul.mubr.bf16.gmra.mxu1 %v1817_v14  ;;  %v1991_v14 = vld [vmem:[#allocation15] sm:$0x1] }
 0x71f   :  { %v1794_v17 = vpack.c.bf16 %v1762_v16, %v1759_v11  ;;  %v1811_v18 = vadd.bf16 %v1805_v57, %v1795_v15  ;;  %2279 = vmatpush1.bf16.msra.mxu1 %v3384_v46 }
 0x720   :  { %v3268_v19 = vpop.f32.mrf.mxu0  ;;  %2280 = vmatprep.subr.bf16.mxu1 %v3392_v48 }
 0x721   :  { %v1810_v20 = vadd.bf16 %v1805_v57, %v1794_v17  ;;  %v1819_v24 = vmax.bf16 %v3698_v35, %v1811_v18  ;;  %v1993_v17 = vpack.i.b16 %v1991_v14, %v1991_v14  ;;  %v3424_v14 = vld [vmem:[#allocation18 + $0xb0] sm:$0xff]  }
 0x722   :  { %v1775_v21 = vpop.f32.mrf.mxu0 }
 0x723   :  { %v1818_v22 = vmax.bf16 %v3698_v35, %v1810_v20  ;;  %2281 = vmatpush1.bf16.msra.mxu1 %v3390_v50 }
 0x724   :  { %v3269_v23 = vpop.f32.mrf.mxu0  ;;  %2282 = vmatprep.subr.bf16.mxu1 %v3398_v52 }
 0x725   :  { %v1797_v25 = vpack.c.bf16 %v3269_v23, %v3268_v19  ;;  %3294 = vmatprep.mubr.bf16.mxu1 %v1818_v22 }
 0x726   :  { %v1778_v26 = vpop.f32.mrf.mxu0  ;;  %3295 = vmatmul.mubr.bf16.gmra.mxu1 %v1819_v24 }
 0x727   :  { %v1796_v27 = vpack.c.bf16 %v1778_v26, %v1775_v21  ;;  %v1813_v29 = vadd.bf16 %v1805_v57, %v1797_v25  ;;  %2283 = vmatpush1.bf16.msra.mxu1 %v3396_v3  ;;  %v1998_v21 = vrot.slane %v1993_v17, %v3849_v31  ;;  %v3427_v17 = vld [vmem:[#allocation18 + $0x28] sm:$0xff]  }
 0x728   :  { %2284 = vmatprep.subr.bf16.mxu1 %v3404_v55 }
 0x729   :  { %v1812_v30 = vadd.bf16 %v1805_v57, %v1796_v27  ;;  %v1821_v33 = vmax.bf16 %v3698_v35, %v1813_v29  ;;  %v3402_v57 = vld [vmem:[#allocation17 + $0x48] ss:$16 sps:$4 sm:$0xff]  }
 0x72b   :  { %v1820_v32 = vmax.bf16 %v3698_v35, %v1812_v30  ;;  %2285 = vmatpush1.bf16.msra.mxu1 %v3402_v57 }
 0x72c   :  { %2286 = vmatprep.subr.bf16.mxu1 %v3410_v61 }
 0x72d   :  { %3298 = vmatprep.mubr.bf16.mxu1 %v1820_v32 }
 0x72e   :  { %3299 = vmatmul.mubr.bf16.gmra.mxu1 %v1821_v33 }
 0x72f   :  { %2306 = vmatprep.mubr.bf16.mxu1 %v3698_v35  ;;  %2287 = vmatpush1.bf16.msra.mxu1 %v3408_v60 }
 0x730   :  { %2288 = vmatprep.subr.bf16.mxu1 %v3416_v63 }
 0x733   :  { %2289 = vmatpush1.bf16.msra.mxu1 %v3414_v1 }
 0x734   :  { %3052 = vmatprep.subr.bf16.mxu1 %v3418_v4  ;;  %v2033_v4 = vld [vmem:[#allocation2 + $0x1] sm:$0x1] }
 0x7d6   :  { %v3288_v5 = vpop.f32.mrf.mxu1 }
 0x7d8   :  { %v1920_v6 = vpop.f32.mrf.mxu1 }
 0x7da   :  { %v3289_v7 = vpop.f32.mrf.mxu1 }
 0x7db   :  { %v1984_v24 = vpack.c.bf16 %v3289_v7, %v3288_v5 }
 0x7dc   :  { %v1923_v8 = vpop.f32.mrf.mxu1 }
 0x7dd   :  { %v1983_v22 = vpack.c.bf16 %v1923_v8, %v1920_v6  ;;  %v2000_v36 = vadd.bf16 %v1998_v21, %v1984_v24  ;;  %v3419_v8 = vld [vmem:[#allocation18 + $0x38] sm:$0xff]  }
 0x7de   :  { %v3292_v9 = vpop.f32.mrf.mxu1  ;;  %v3434_v24 = vld [vmem:[#allocation18 + $0xd8] sm:$0xff]  }
 0x7df   :  { %v1999_v32 = vadd.bf16 %v1998_v21, %v1983_v22  ;;  %v2008_v47 = vmax.bf16 %v3698_v35, %v2000_v36  ;;  %v3432_v22 = vld [vmem:[#allocation18 + $0xa0] sm:$0xff]   ;;  %v3443_v36 = vld [vmem:[#allocation18 + $0x8] sm:$0xff]  }
 0x7e0   :  { %v1936_v10 = vpop.f32.mrf.mxu1 }
 0x7e1   :  { %v2007_v43 = vmax.bf16 %v3698_v35, %v1999_v32  ;;  %v3440_v32 = vld [vmem:[#allocation18 + $0x90] sm:$0xff]  }
 0x7e2   :  { %v3293_v11 = vpop.f32.mrf.mxu1 }
 0x7e3   :  { %v1986_v25 = vpack.c.bf16 %v3293_v11, %v3292_v9  ;;  %v3420_v9 = vld [vmem:[#allocation18 + $0xb8] sm:$0xff]   ;;  %v3421_v11 = vld [vmem:[#allocation18 + $0x70] sm:$0xff]  }
 0x7e4   :  { %v1939_v12 = vpop.f32.mrf.mxu1 }
 0x7e5   :  { %v1985_v27 = vpack.c.bf16 %v1939_v12, %v1936_v10  ;;  %v2002_v37 = vadd.bf16 %v1998_v21, %v1986_v25  ;;  %v3422_v12 = vld [vmem:[#allocation18 + $0xf0] sm:$0xff]   ;;  %v3435_v25 = vld [vmem:[#allocation18 + $0x18] sm:$0xff]  }
 0x7e6   :  { %v3296_v13 = vpop.f32.mrf.mxu1 }
 0x7e7   :  { %v2001_v39 = vadd.bf16 %v1998_v21, %v1985_v27  ;;  %v2010_v48 = vmax.bf16 %v3698_v35, %v2002_v37  ;;  %v3437_v27 = vld [vmem:[#allocation18 + $0x50] sm:$0xff]   ;;  %v3444_v37 = vld [vmem:[#allocation18 + $0x88] sm:$0xff]  }
 0x7e8   :  { %v1952_v15 = vpop.f32.mrf.mxu1 }
 0x7e9   :  { %v2009_v49 = vmax.bf16 %v3698_v35, %v2001_v39  ;;  %v3446_v39 = vld [vmem:[#allocation18 + $0xc0] sm:$0xff]  }
 0x7ea   :  { %v3297_v16 = vpop.f32.mrf.mxu1 }
 0x7eb   :  { %v1988_v23 = vpack.c.bf16 %v3297_v16, %v3296_v13  ;;  %v3423_v13 = vld [vmem:[#allocation18 + $0x30] sm:$0xff]   ;;  %v3426_v16 = vld [vmem:[#allocation18 + $0xe8] sm:$0xff]  }
 0x7ec   :  { %v1955_v18 = vpop.f32.mrf.mxu1 }
 0x7ed   :  { %v1987_v19 = vpack.c.bf16 %v1955_v18, %v1952_v15  ;;  %v2004_v33 = vadd.bf16 %v1998_v21, %v1988_v23  ;;  %v3425_v15 = vld [vmem:[#allocation18 + $0x68] sm:$0xff]   ;;  %v3433_v23 = vld [vmem:[#allocation18 + $0x58] sm:$0xff]  }
 0x7ee   :  { %v3300_v20 = vpop.f32.mrf.mxu1  ;;  %v3428_v18 = vld [vmem:[#allocation18 + $0xa8] sm:$0xff]  }
 0x7ef   :  { %v2003_v29 = vadd.bf16 %v1998_v21, %v1987_v19  ;;  %v2012_v44 = vmax.bf16 %v3698_v35, %v2004_v33  ;;  %v3429_v19 = vld [vmem:[#allocation18 + $0x60] sm:$0xff]   ;;  %v3441_v33 = vld [vmem:[#allocation18 + $0x48] sm:$0xff]  }
 0x7f0   :  { %v1968_v26 = vpop.f32.mrf.mxu1 }
 0x7f1   :  { %v2011_v40 = vmax.bf16 %v3698_v35, %v2003_v29  ;;  %v2016_v52 = vmax.bf16 %v2012_v44, %v2008_v47  ;;  %v3438_v29 = vld [vmem:[#allocation18 + $0xd0] sm:$0xff]  }
 0x7f2   :  { %v3301_v30 = vpop.f32.mrf.mxu1 }
 0x7f3   :  { %v1990_v34 = vpack.c.bf16 %v3301_v30, %v3300_v20  ;;  %v2015_v50 = vmax.bf16 %v2011_v40, %v2007_v43  ;;  %v3430_v20 = vld [vmem:[#allocation18 + $0xe0] sm:$0xff]   ;;  %v3439_v30 = vld [vmem:[#allocation18 + $0x10] sm:$0xff]  }
 0x7f4   :  { %v1971_v38 = vpop.f32.mrf.mxu1  ;;  %v3447_v40 = vld [vmem:[#allocation18] sm:$0xff]  }
 0x7f5   :  { %v2006_v41 = vadd.bf16 %v1998_v21, %v1990_v34  ;;  %v1989_v42 = vpack.c.bf16 %v1971_v38, %v1968_v26  ;;  %v2019_v54 = vmax.bf16 %v2016_v52, %v2015_v50  ;;  %v3436_v26 = vld [vmem:[#allocation18 + $0x98] sm:$0xff]   ;;  %v3442_v34 = vld [vmem:[#allocation18 + $0xc8] sm:$0xff]   ;;  %v3445_v38 = vld [vmem:[#allocation18 + $0x40] sm:$0xff]  }
 0x7f7   :  { %v2014_v45 = vmax.bf16 %v3698_v35, %v2006_v41  ;;  %v2005_v46 = vadd.bf16 %v1998_v21, %v1989_v42  ;;  %v3431_v21 = vld [vmem:[#allocation18 + $0x20] sm:$0xff]   ;;  %v3700_v42 = vmov 1966171168  }
 0x7f8   :  { %v3448_v41 = vld [vmem:[#allocation18 + $0x80] sm:$0xff]   ;;  %v2330_v43 = vunpack.c.l.s4 %v3700_v42 }
 0x7f9   :  { %v2013_v51 = vmax.bf16 %v3698_v35, %v2005_v46  ;;  %v2018_v53 = vmax.bf16 %v2014_v45, %v2010_v48  ;;  %v2882_v45 = vld.sshfl [vmem:[%s4089_s12] sm:$0x33 pattern:$0x75316420] }
 0x7fa   :  { %v2331_v44 = vunpack.c.0.s8 %v2330_v43  ;;  %v2328_v47 = vcombine.high %v2882_v45, %v2882_v45 }
 0x7fb   :  { %v2017_v3 = vmax.bf16 %v2013_v51, %v2009_v49 }
 0x7fc   :  { %v2334_v46 = vsub.s32 %v2331_v44, %v3846_v28 }
 0x7fd   :  { %v2020_v55 = vmax.bf16 %v2018_v53, %v2017_v3 }
 0x7fe   :  { %v2335_v48 = vrot.slane %v2882_v45, %v2334_v46  ;;  %v2342_v49 = vrot.slane %v2328_v47, %v2334_v46 }
 0x7ff   :  { %v2021_v56 = vmax.bf16 %v2020_v55, %v2019_v54 }
 0x800   :  { %v2343_v50 = vcombine.high %v2335_v48, %v2335_v48  ;;  %v2344_v51 = vcombine.high %v2342_v49, %v2342_v49  ;;  %v2346_v52 = vpack.i.b16 %v2335_v48, %v2335_v48  ;;  %v2353_v3 = vpack.i.b16 %v2342_v49, %v2342_v49 }
 0x801   :  { %v2022_v57 = vunpack.i.l.bf16 %v2021_v56  ;;  %v2023_v58 = vunpack.i.h.bf16 %v2021_v56 }
 0x802   :  { %v2360_v53 = vpack.i.b16 %v2343_v50, %v2343_v50  ;;  %v2367_v54 = vpack.i.b16 %v2344_v51, %v2344_v51  ;;  %v2351_v56 = vrot.slane %v2346_v52, %v3849_v31 }
 0x803   :  { %v2024_v59 = vmax.f32 %v2022_v57, %v2023_v58 }
 0x804   :  { %v2365_v58 = vrot.slane %v2360_v53, %v3849_v31  ;;  %v2372_v28 = vrot.slane %v2367_v54, %v3849_v31 }
 0x805   :  { %v2025_v60 = vrot.slane %v2024_v59, 4 }
 0x807   :  { %v2026_v61 = vmax.f32 %v2024_v59, %v2025_v60 }
 0x809   :  { %v2027_v62 = vrot.slane %v2026_v61, 2 }
 0x80b   :  { %v2028_v63 = vmax.f32 %v2026_v61, %v2027_v62  ;;  %v2358_v61 = vrot.slane %v2353_v3, %v3849_v31 }
 0x80d   :  { %v2029_v0 = vrot.slane %v2028_v63, 1 }
 0x80f   :  { %v2030_v1 = vmax.f32 %v2028_v63, %v2029_v0 }
 0x811   :  { %v2031_v2 = vpack.i.bf16 %v2030_v1, %v2030_v1 }
 0x813   :  { %v2032_v5 = vunpack.c.l.bf16 %v2031_v2 }
 0x815   :  { %v2034_v6 = vmax.f32 %v2033_v4, %v2032_v5 }
 0x817   :  { %2035 = vst [vmem:[#allocation2 + $0x1] sm:$0x1] %v2034_v6 }
 0x81e   :  { %v2039_v7 = vld [vmem:[#allocation2] sm:$0x3] }
 0x81f   :  { %v2040_v10 = vpack.c.bf16 %v2039_v7, %v2039_v7 }
 0x821   :  { %2266 = vmatmul.mubr.bf16.vlgmr.msra.gmra.mxu0 %v2040_v10  ;;  %2307 = vmatmul.mubr.bf16.vlgmr.msra.gmra.mxu1 %v2040_v10 }
 0x822   :  { %3031 = vmatpush3.bf16.msra.mxu0 %v3419_v8  ;;  %3053 = vmatpush3.bf16.msra.mxu1 %v3420_v9 }
 0x823   :  { %3032 = vmatprep.subr.bf16.mxu0 %v3421_v11  ;;  %3054 = vmatprep.subr.bf16.mxu1 %v3422_v12 }
 0x826   :  { %3033 = vmatpush3.bf16.msra.mxu0 %v3423_v13  ;;  %3055 = vmatpush3.bf16.msra.mxu1 %v3424_v14 }
 0x827   :  { %3034 = vmatprep.subr.bf16.mxu0 %v3425_v15  ;;  %3056 = vmatprep.subr.bf16.mxu1 %v3426_v16  ;;  %v2883_v16 = vld [vmem:[%s4091_s14] ss:$0 sm:$0xff] }
 0x82a   :  { %3035 = vmatpush3.bf16.msra.mxu0 %v3427_v17  ;;  %3057 = vmatpush3.bf16.msra.mxu1 %v3428_v18 }
 0x82b   :  { %3036 = vmatprep.subr.bf16.mxu0 %v3429_v19  ;;  %3058 = vmatprep.subr.bf16.mxu1 %v3430_v20 }
 0x82e   :  { %3037 = vmatpush3.bf16.msra.mxu0 %v3431_v21  ;;  %3059 = vmatpush3.bf16.msra.mxu1 %v3432_v22 }
 0x82f   :  { %3038 = vmatprep.subr.bf16.mxu0 %v3433_v23  ;;  %3060 = vmatprep.subr.bf16.mxu1 %v3434_v24 }
 0x832   :  { %3039 = vmatpush3.bf16.msra.mxu0 %v3435_v25  ;;  %3061 = vmatpush3.bf16.msra.mxu1 %v3436_v26 }
 0x833   :  { %3040 = vmatprep.subr.bf16.mxu0 %v3437_v27  ;;  %3062 = vmatprep.subr.bf16.mxu1 %v3438_v29 }
 0x836   :  { %3041 = vmatpush3.bf16.msra.mxu0 %v3439_v30  ;;  %3063 = vmatpush3.bf16.msra.mxu1 %v3440_v32 }
 0x837   :  { %3042 = vmatprep.subr.bf16.mxu0 %v3441_v33  ;;  %3064 = vmatprep.subr.bf16.mxu1 %v3442_v34 }
 0x83a   :  { %3043 = vmatpush3.bf16.msra.mxu0 %v3443_v36  ;;  %3065 = vmatpush3.bf16.msra.mxu1 %v3444_v37 }
 0x83b   :  { %3044 = vmatprep.subr.bf16.mxu0 %v3445_v38  ;;  %3066 = vmatprep.subr.bf16.mxu1 %v3446_v39 }
 0x83e   :  { %3045 = vmatpush3.bf16.msra.mxu0 %v3447_v40  ;;  %3067 = vmatpush3.bf16.msra.mxu1 %v3448_v41 }
 0x8e1   :  { %v2267_v55 = vpop.f32.mrf.mxu0  ;;  %v2308_v57 = vpop.f32.mrf.mxu1 }
 0x8e2   :  { %v2315_v59 = vpack.c.bf16 %v2267_v55, %v2267_v55  ;;  %v2317_v60 = vpack.c.bf16 %v2308_v57, %v2308_v57 }
 0x8e3   :  { %v2269_v62 = vpop.f32.mrf.mxu0  ;;  %v2310_v63 = vpop.f32.mrf.mxu1 }
 0x8e4   :  { %v2316_v0 = vpack.c.bf16 %v2269_v62, %v2269_v62  ;;  %v2318_v1 = vpack.c.bf16 %v2310_v63, %v2310_v63  ;;  %v2373_v2 = vadd.bf16 %v2351_v56, %v2315_v59  ;;  %v2375_v4 = vadd.bf16 %v2365_v58, %v2317_v60 }
 0x8e5   :  { %v2271_v5 = vpop.f32.mrf.mxu0  ;;  %v2312_v6 = vpop.f32.mrf.mxu1 }
 0x8e6   :  { %v2374_v7 = vadd.bf16 %v2358_v61, %v2316_v0  ;;  %v2376_v8 = vadd.bf16 %v2372_v28, %v2318_v1  ;;  %v2377_v13 = vmax.bf16 %v3698_v35, %v2373_v2  ;;  %v2379_v31 = vmax.bf16 %v3698_v35, %v2375_v4 }
 0x8e7   :  { %v2272_v9 = vpop.f32.mrf.mxu0  ;;  %v2313_v10 = vpop.f32.mrf.mxu1 }
 0x8e8   :  { %v2378_v11 = vmax.bf16 %v3698_v35, %v2374_v7  ;;  %v2380_v12 = vmax.bf16 %v3698_v35, %v2376_v8 }
 0x8ea   :  { %2676 = vmatprep.mubr.bf16.mxu0 %v2378_v11  ;;  %2716 = vmatprep.mubr.bf16.mxu1 %v2380_v12 }
 0x8eb   :  { %2677 = vmatmul.mubr.bf16.vlgmr.msra.gmra.mxu0 %v2377_v13  ;;  %2717 = vmatmul.mubr.bf16.vlgmr.msra.gmra.mxu1 %v2379_v31 }
 0x9ab   :  { %v3046_v14 = vpop.f32.mrf.mxu0  ;;  %v3068_v15 = vpop.f32.mrf.mxu1 }
 0x9ad   :  { %v3047_v17 = vpop.f32.mrf.mxu0  ;;  %v3069_v18 = vpop.f32.mrf.mxu1 }
 0x9ae   :  { %v3048_v19 = vadd.f32 %v3047_v17, %v3046_v14  ;;  %v3070_v23 = vadd.f32 %v3069_v18, %v3068_v15 }
 0x9af   :  { %v3049_v20 = vpop.f32.mrf.mxu0  ;;  %v3071_v21 = vpop.f32.mrf.mxu1 }
 0x9b0   :  { %v2679_v22 = vadd.f32 %v3048_v19, %v2883_v16 }
 0x9b1   :  { %v3050_v35 = vpop.f32.mrf.mxu0  ;;  %v3072_v24 = vpop.f32.mrf.mxu1 }
 0x9b2   :  { %v2719_v25 = vadd.f32 %v3070_v23, %v2679_v22 }
 0x9b4   :  { %2724 = vst [vmem:[#allocation20] sm:$0x3] %v2719_v25 }
 0x9b5   :  { %3660 = shalt.err (!%p3657_p12)
}
 0x9b6   :  { %2734 = dma.vmem_to_hbm [thread:$0]  %s2732_s13, 32, %s4092_s15, [#allocation5]  }
 0x9b7   :  { %3681 = dma.done.wait [#allocation5], 32  }
 0x9b8   :  { %3682 = vsyncadd [#allocation5], 4294967264 }
 0x9b9   :  { %2738 = vsyncpa [#allocation4], 1 }
 0x9ba   :  { %2739 = vsyncpa [#allocation7], 1 }
 0x9bb   :  { %2740 = vsyncpa [#allocation10], 1 }
 0x9bc   :  { %2741 = vsyncpa [#allocation13], 1 }
 0x9bd   :  { %2742 = vsyncpa [#allocation16], 1 }
 0x9be   :  { %2743 = vsyncpa [#allocation19], 1 }
 0x9bf   :  { %2744 = vsyncpa [#allocation5], 1 }

</bundles_post_ra>
